<compile_context>
chip_gen: v7x
topology: tpu7x:2x2x1
jax: 0.10.0
libtpu: 0.0.40
codegen_flags: <defaults>
</compile_context>

<pallas_src>
import math

import jax
import jax.numpy as jnp
from jax import lax
from jax.experimental import pallas as pl
from jax.experimental.pallas import tpu as pltpu

NEG_INF = -1e9
LN_EPS = 1e-5


def _softmax_lastdim(s):
    # s already contains the additive attention bias.
    m = jnp.max(s, axis=-1, keepdims=True)
    p = jnp.exp(s - m)
    denom = jnp.sum(p, axis=-1, keepdims=True)
    return p * pl.reciprocal(denom, approx=True)


# --------------------------- fused forward kernel ----------------------------
def fused_fce_kernel(
    disp_ref,        # [1, M, T, H]
    orig_ref,        # [1, M, H]
    hist_ref,        # [1, Nh, H]
    agent_ref,       # [1, Na, H]
    map_ref,         # [1, Nm, H]
    fc_bias_ref,     # [1, M, T, T]  additive bias (0 / -1e9)
    pool_bias_ref,   # [1, M, T]
    f2h_bias_ref,    # [1, M, Nh]
    f2a_bias_ref,    # [1, M, Na]
    f2m_bias_ref,    # [1, M, Nm]
    w_ref,           # [4, L, H, 3H]  packed QKV weights: st, f2h, f2a, f2m
    gamma_ref,       # [1, H]
    beta_ref,        # [1, H]
    out_ref,         # [1, M, T, H]
):
    M, T, H = disp_ref.shape[1], disp_ref.shape[2], disp_ref.shape[3]
    L = w_ref.shape[1]
    scale = 1.0 / math.sqrt(H)

    disp = disp_ref[0]                               # [M, T, H]
    x = disp + orig_ref[0][:, None, :]               # [M, T, H]

    # ---- SpatioTemporalNet: temporal self-attention + masked max pool ----
    xr = x.reshape(M * T, H)                         # batch all rows for QKV matmul
    fc_bias = fc_bias_ref[0]                         # [M, T, T]
    for layer in range(L):
        qkv = jnp.dot(xr, w_ref[0, layer],
                      preferred_element_type=jnp.float32)        # [M*T, 3H]
        q = qkv[:, 0:H].reshape(M, T, H)
        k = qkv[:, H:2 * H].reshape(M, T, H)
        v = qkv[:, 2 * H:3 * H].reshape(M, T, H)
        s = jnp.einsum("mtd,msd->mts", q, k,
                       preferred_element_type=jnp.float32) * scale + fc_bias
        p = _softmax_lastdim(s)
        xr = jnp.einsum("mts,msd->mtd", p, v,
                        preferred_element_type=jnp.float32).reshape(M * T, H)
    # masked max pool over T (additive bias: masked steps pushed to ~-1e9)
    pooled = jnp.max(xr.reshape(M, T, H) + pool_bias_ref[0][:, :, None],
                     axis=1)                          # [M, H]

    # ---- CrossEncoder stacks (f2h, f2a, f2m) ----
    def cross(xq, ctx, bias, mod):
        for layer in range(L):
            w = w_ref[mod, layer]                     # [H, 3H]
            q = jnp.dot(xq, w[:, 0:H],
                        preferred_element_type=jnp.float32)       # [M, H]
            kv = jnp.dot(ctx, w[:, H:3 * H],
                         preferred_element_type=jnp.float32)      # [N, 2H]
            k = kv[:, 0:H]
            v = kv[:, H:2 * H]
            # contract last dims of q and k directly (no .T / transpose)
            s = lax.dot_general(q, k, (((1,), (1,)), ((), ())),
                                preferred_element_type=jnp.float32) * scale + bias
            p = _softmax_lastdim(s)
            xq = jnp.dot(p, v, preferred_element_type=jnp.float32)
        return xq

    y = cross(pooled, hist_ref[0], f2h_bias_ref[0], 1)
    y = cross(y, agent_ref[0], f2a_bias_ref[0], 2)
    y = cross(y, map_ref[0], f2m_bias_ref[0], 3)

    # ---- residual add + LayerNorm ----
    out = disp + y[:, None, :]                        # [M, T, H]
    mean = jnp.mean(out, axis=-1, keepdims=True)
    var = jnp.mean(jnp.square(out - mean), axis=-1, keepdims=True)
    xn = (out - mean) * lax.rsqrt(var + LN_EPS)
    out_ref[0] = xn * gamma_ref[...] + beta_ref[...]


# --------------------------------- wrapper -----------------------------------
def future_cross_encoder_forward(
    displacement_feature,
    target_agent_orig_embedding,
    target_agent_history_feature,
    map_features,
    agent_features,
    f2h_cross_mask,
    f2a_cross_mask,
    f2m_cross_mask,
    future_mask,
    future_cross_mask,
    params,
):
    B, M, T, H = displacement_feature.shape
    Nh = target_agent_history_feature.shape[1]
    Na = agent_features.shape[1]
    Nm = map_features.shape[1]

    def pack(w3):  # (wq, wk, wv) each [L, H, H] -> [L, H, 3H]
        wq, wk, wv = w3
        return jnp.concatenate([wq, wk, wv], axis=-1)

    w_all = jnp.stack(
        [pack(params["st"]), pack(params["f2h"]),
         pack(params["f2a"]), pack(params["f2m"])], axis=0)       # [4, L, H, 3H]
    L = w_all.shape[1]

    # 1.0 -> 0 (attend), 0.0 -> -1e9 (masked); computed once outside the kernel.
    def to_bias(m):
        return (m - 1.0) * 1e9

    fc_bias = to_bias(future_cross_mask)       # [B, M, T, T]
    pool_bias = to_bias(future_mask)           # [B, M, T]
    f2h_bias = to_bias(f2h_cross_mask)         # [B, M, Nh]
    f2a_bias = to_bias(f2a_cross_mask)         # [B, M, Na]
    f2m_bias = to_bias(f2m_cross_mask)         # [B, M, Nm]

    grid_spec = pltpu.PrefetchScalarGridSpec(
        num_scalar_prefetch=0,
        grid=(B,),
        in_specs=[
            pl.BlockSpec((1, M, T, H), lambda b: (b, 0, 0, 0)),     # disp
            pl.BlockSpec((1, M, H), lambda b: (b, 0, 0)),           # orig
            pl.BlockSpec((1, Nh, H), lambda b: (b, 0, 0)),          # history
            pl.BlockSpec((1, Na, H), lambda b: (b, 0, 0)),          # agents
            pl.BlockSpec((1, Nm, H), lambda b: (b, 0, 0)),          # maps
            pl.BlockSpec((1, M, T, T), lambda b: (b, 0, 0, 0)),     # fut cross bias
            pl.BlockSpec((1, M, T), lambda b: (b, 0, 0)),           # pool bias
            pl.BlockSpec((1, M, Nh), lambda b: (b, 0, 0)),          # f2h bias
            pl.BlockSpec((1, M, Na), lambda b: (b, 0, 0)),          # f2a bias
            pl.BlockSpec((1, M, Nm), lambda b: (b, 0, 0)),          # f2m bias
            pl.BlockSpec((4, L, H, 3 * H), lambda b: (0, 0, 0, 0)), # packed weights
            pl.BlockSpec((1, H), lambda b: (0, 0)),                 # gamma
            pl.BlockSpec((1, H), lambda b: (0, 0)),                 # beta
        ],
        out_specs=pl.BlockSpec((1, M, T, H), lambda b: (b, 0, 0, 0)),
    )

    return pl.pallas_call(
        fused_fce_kernel,
        out_shape=jax.ShapeDtypeStruct((B, M, T, H), jnp.float32),
        grid_spec=grid_spec,
        compiler_params=pltpu.CompilerParams(dimension_semantics=("parallel",)),
    )(
        displacement_feature,
        target_agent_orig_embedding,
        target_agent_history_feature,
        agent_features,
        map_features,
        fc_bias,
        pool_bias,
        f2h_bias,
        f2a_bias,
        f2m_bias,
        w_all,
        params["gamma"],
        params["beta"],
    )


# ------------------------------ pure-JAX reference ---------------------------
def reference_forward(inputs, params):
    (disp, orig, hist, mapf, agf, f2h_m, f2a_m, f2m_m, fmask, fcmask) = inputs
    B, M, T, H = disp.shape
    scale = 1.0 / math.sqrt(H)
    x = disp + orig[:, :, None, :]
    wq, wk, wv = params["st"]
    for layer in range(wq.shape[0]):
        q = x @ wq[layer]
        k = x @ wk[layer]
        v = x @ wv[layer]
        s = jnp.einsum("bmtd,bmsd->bmts", q, k) * scale
        s = jnp.where(fcmask > 0, s, NEG_INF)
        x = jnp.einsum("bmts,bmsd->bmtd", jax.nn.softmax(s, axis=-1), v)
    pooled = jnp.max(jnp.where(fmask[..., None] > 0, x, NEG_INF), axis=2)

    def cross(xq, ctx, mask, w):
        cwq, cwk, cwv = w
        for layer in range(cwq.shape[0]):
            q = xq @ cwq[layer]
            k = ctx @ cwk[layer]
            v = ctx @ cwv[layer]
            s = jnp.einsum("bmd,bnd->bmn", q, k) * scale
            s = jnp.where(mask > 0, s, NEG_INF)
            xq = jnp.einsum("bmn,bnd->bmd", jax.nn.softmax(s, axis=-1), v)
        return xq

    y = cross(pooled, hist, f2h_m, params["f2h"])
    y = cross(y, agf, f2a_m, params["f2a"])
    y = cross(y, mapf, f2m_m, params["f2m"])
    out = y[:, :, None, :] + disp
    mean = out.mean(-1, keepdims=True)
    var = jnp.square(out - mean).mean(-1, keepdims=True)
    return (out - mean) / jnp.sqrt(var + LN_EPS) * params["gamma"] + params["beta"]


# ---------------------------------- main --------------------------------------
if __name__ == "__main__":
    B, M, T, H = 2, 4, 8, 32
    Nh, Na, Nm = 8, 8, 16
    sub_layers = 2

    key = jax.random.PRNGKey(0)
    keys = jax.random.split(key, 32)
    kit = iter(keys)

    def init_stack(k):
        return jax.random.normal(k, (sub_layers, H, H), jnp.float32) / math.sqrt(H)

    params = {
        "st": tuple(init_stack(next(kit)) for _ in range(3)),
        "f2h": tuple(init_stack(next(kit)) for _ in range(3)),
        "f2a": tuple(init_stack(next(kit)) for _ in range(3)),
        "f2m": tuple(init_stack(next(kit)) for _ in range(3)),
        "gamma": jnp.ones((1, H), jnp.float32),
        "beta": jnp.zeros((1, H), jnp.float32),
    }

    displacement_feature = jax.random.normal(next(kit), (B, M, T, H), jnp.float32)
    target_agent_orig_embedding = jax.random.normal(next(kit), (B, M, H), jnp.float32)
    target_agent_history_feature = jax.random.normal(next(kit), (B, Nh, H), jnp.float32)
    map_features = jax.random.normal(next(kit), (B, Nm, H), jnp.float32)
    agent_features = jax.random.normal(next(kit), (B, Na, H), jnp.float32)

    def make_mask(k, shape):
        m = jax.random.bernoulli(k, 0.8, shape).astype(jnp.float32)
        return m.at[..., 0].set(1.0)  # guarantee at least one valid entry per row

    f2h_cross_mask = make_mask(next(kit), (B, M, Nh))
    f2a_cross_mask = make_mask(next(kit), (B, M, Na))
    f2m_cross_mask = make_mask(next(kit), (B, M, Nm))
    future_mask = make_mask(next(kit), (B, M, T))
    future_cross_mask = make_mask(next(kit), (B, M, T, T))

    inputs = (
        displacement_feature,
        target_agent_orig_embedding,
        target_agent_history_feature,
        map_features,
        agent_features,
        f2h_cross_mask,
        f2a_cross_mask,
        f2m_cross_mask,
        future_mask,
        future_cross_mask,
    )

    out = future_cross_encoder_forward(*inputs, params)
    out = jax.block_until_ready(out)

    ref = reference_forward(inputs, params)
    assert out.shape == (B, M, T, H)
    # tolerance loosened vs f32-exact because the kernel uses the EUP
    # approximate reciprocal for the softmax normalization.
    assert jnp.allclose(out, ref, rtol=2e-2, atol=2e-2), "kernel mismatch vs JAX reference"

    print("KERNEL_OK")
</pallas_src>

<mosaic_0001>
module attributes {stable_mosaic.version = 11 : i64} {
  func.func @fused_fce_kernel(%arg0: i32, %arg1: memref<1x4x8x32xf32, #tpu.memory_space<vmem>>, %arg2: memref<1x4x32xf32, #tpu.memory_space<vmem>>, %arg3: memref<1x8x32xf32, #tpu.memory_space<vmem>>, %arg4: memref<1x8x32xf32, #tpu.memory_space<vmem>>, %arg5: memref<1x16x32xf32, #tpu.memory_space<vmem>>, %arg6: memref<1x4x8x8xf32, #tpu.memory_space<vmem>>, %arg7: memref<1x4x8xf32, #tpu.memory_space<vmem>>, %arg8: memref<1x4x8xf32, #tpu.memory_space<vmem>>, %arg9: memref<1x4x8xf32, #tpu.memory_space<vmem>>, %arg10: memref<1x4x16xf32, #tpu.memory_space<vmem>>, %arg11: memref<4x2x32x96xf32, #tpu.memory_space<vmem>>, %arg12: memref<1x32xf32, #tpu.memory_space<vmem>>, %arg13: memref<1x32xf32, #tpu.memory_space<vmem>>, %arg14: memref<1x4x8x32xf32, #tpu.memory_space<vmem>>) attributes {dimension_semantics = [#tpu.dimension_semantics<parallel>], iteration_bounds = array<i64: 2>, scalar_prefetch = 0 : i64, scratch_operands = 0 : i64, tpu.core_type = #tpu.core_type<tc>, window_params = [{transform_indices = @transform_0, window_bounds = array<i64: 1, 4, 8, 32>}, {transform_indices = @transform_1, window_bounds = array<i64: 1, 4, 32>}, {transform_indices = @transform_2, window_bounds = array<i64: 1, 8, 32>}, {transform_indices = @transform_3, window_bounds = array<i64: 1, 8, 32>}, {transform_indices = @transform_4, window_bounds = array<i64: 1, 16, 32>}, {transform_indices = @transform_5, window_bounds = array<i64: 1, 4, 8, 8>}, {transform_indices = @transform_6, window_bounds = array<i64: 1, 4, 8>}, {transform_indices = @transform_7, window_bounds = array<i64: 1, 4, 8>}, {transform_indices = @transform_8, window_bounds = array<i64: 1, 4, 8>}, {transform_indices = @transform_9, window_bounds = array<i64: 1, 4, 16>}, {pipeline_mode = #tpu.pipeline_mode<synchronous>, transform_indices = @transform_10, window_bounds = array<i64: 4, 2, 32, 96>}, {pipeline_mode = #tpu.pipeline_mode<synchronous>, transform_indices = @transform_11, window_bounds = array<i64: 1, 32>}, {pipeline_mode = #tpu.pipeline_mode<synchronous>, transform_indices = @transform_12, window_bounds = array<i64: 1, 32>}, {transform_indices = @transform_13, window_bounds = array<i64: 1, 4, 8, 32>}]} {
    %c0 = arith.constant 0 : index
    %c0_0 = arith.constant 0 : index
    %c0_1 = arith.constant 0 : index
    %c0_2 = arith.constant 0 : index
    %0 = vector.load %arg1[%c0, %c0_0, %c0_1, %c0_2] : memref<1x4x8x32xf32, #tpu.memory_space<vmem>>, vector<1x4x8x32xf32>
    %1 = vector.shape_cast %0 : vector<1x4x8x32xf32> to vector<4x8x32xf32>
    %c0_3 = arith.constant 0 : index
    %c0_4 = arith.constant 0 : index
    %c0_5 = arith.constant 0 : index
    %2 = vector.load %arg2[%c0_3, %c0_4, %c0_5] : memref<1x4x32xf32, #tpu.memory_space<vmem>>, vector<1x4x32xf32>
    %3 = vector.shape_cast %2 : vector<1x4x32xf32> to vector<4x32xf32>
    %4 = vector.shape_cast %3 : vector<4x32xf32> to vector<4x1x32xf32>
    %5 = vector.broadcast %4 : vector<4x1x32xf32> to vector<4x8x32xf32>
    %6 = arith.addf %1, %5 : vector<4x8x32xf32>
    %7 = vector.shape_cast %6 : vector<4x8x32xf32> to vector<32x32xf32>
    %c0_6 = arith.constant 0 : index
    %c0_7 = arith.constant 0 : index
    %c0_8 = arith.constant 0 : index
    %c0_9 = arith.constant 0 : index
    %8 = vector.load %arg6[%c0_6, %c0_7, %c0_8, %c0_9] : memref<1x4x8x8xf32, #tpu.memory_space<vmem>>, vector<1x4x8x8xf32>
    %9 = vector.shape_cast %8 : vector<1x4x8x8xf32> to vector<4x8x8xf32>
    %c0_10 = arith.constant 0 : index
    %c0_11 = arith.constant 0 : index
    %c0_12 = arith.constant 0 : index
    %c0_13 = arith.constant 0 : index
    %10 = vector.load %arg11[%c0_10, %c0_11, %c0_12, %c0_13] : memref<4x2x32x96xf32, #tpu.memory_space<vmem>>, vector<1x1x32x96xf32>
    %11 = vector.shape_cast %10 : vector<1x1x32x96xf32> to vector<32x96xf32>
    %cst = arith.constant dense<0.000000e+00> : vector<32x96xf32>
    %12 = tpu.matmul %7, %11, %cst {dimension_numbers = #tpu.dot_dimension_numbers<[1], [0], [0], [1], [0, 0, 1, 1], [], []>} : vector<32x32xf32>, vector<32x96xf32>, vector<32x96xf32> -> vector<32x96xf32>
    %13 = vector.extract_strided_slice %12 {offsets = [0, 0], sizes = [32, 32], strides = [1, 1]} : vector<32x96xf32> to vector<32x32xf32>
    %14 = vector.shape_cast %13 : vector<32x32xf32> to vector<4x8x32xf32>
    %15 = vector.extract_strided_slice %12 {offsets = [0, 32], sizes = [32, 32], strides = [1, 1]} : vector<32x96xf32> to vector<32x32xf32>
    %16 = vector.shape_cast %15 : vector<32x32xf32> to vector<4x8x32xf32>
    %17 = vector.extract_strided_slice %12 {offsets = [0, 64], sizes = [32, 32], strides = [1, 1]} : vector<32x96xf32> to vector<32x32xf32>
    %18 = vector.shape_cast %17 : vector<32x32xf32> to vector<4x8x32xf32>
    "tpu.trace_start"() <{level = 10 : i32, message = "mtd,msd->mts"}> : () -> ()
    %cst_14 = arith.constant dense<0.000000e+00> : vector<4x8x8xf32>
    %19 = tpu.matmul %14, %16, %cst_14 {dimension_numbers = #tpu.dot_dimension_numbers<[2], [2], [1], [1], [0, 0, 0, 1, 1, 1], [0], [0]>} : vector<4x8x32xf32>, vector<4x8x32xf32>, vector<4x8x8xf32> -> vector<4x8x8xf32>
    "tpu.trace_stop"() : () -> ()
    %cst_15 = arith.constant 0.176776692 : f32
    %20 = vector.broadcast %cst_15 : f32 to vector<4x8x8xf32>
    %21 = arith.mulf %19, %20 : vector<4x8x8xf32>
    %22 = arith.addf %21, %9 : vector<4x8x8xf32>
    %cst_16 = arith.constant dense<0xFF800000> : vector<4x8xf32>
    %23 = vector.multi_reduction <maximumf>, %22, %cst_16 [2] : vector<4x8x8xf32> to vector<4x8xf32>
    %24 = vector.shape_cast %23 : vector<4x8xf32> to vector<4x8x1xf32>
    %25 = vector.broadcast %24 : vector<4x8x1xf32> to vector<4x8x8xf32>
    %26 = arith.subf %22, %25 : vector<4x8x8xf32>
    %27 = math.exp %26 : vector<4x8x8xf32>
    %cst_17 = arith.constant dense<0.000000e+00> : vector<4x8xf32>
    %28 = vector.multi_reduction <add>, %27, %cst_17 [2] : vector<4x8x8xf32> to vector<4x8xf32>
    %29 = vector.shape_cast %28 : vector<4x8xf32> to vector<4x8x1xf32>
    %30 = tpu.reciprocal %29 {approx = true} : vector<4x8x1xf32> -> vector<4x8x1xf32>
    %31 = vector.broadcast %30 : vector<4x8x1xf32> to vector<4x8x8xf32>
    %32 = arith.mulf %27, %31 : vector<4x8x8xf32>
    "tpu.trace_start"() <{level = 10 : i32, message = "mts,msd->mtd"}> : () -> ()
    %cst_18 = arith.constant dense<0.000000e+00> : vector<4x8x32xf32>
    %33 = tpu.matmul %32, %18, %cst_18 {dimension_numbers = #tpu.dot_dimension_numbers<[2], [1], [1], [2], [0, 0, 0, 1, 1, 2], [0], [0]>} : vector<4x8x8xf32>, vector<4x8x32xf32>, vector<4x8x32xf32> -> vector<4x8x32xf32>
    "tpu.trace_stop"() : () -> ()
    %34 = vector.shape_cast %33 : vector<4x8x32xf32> to vector<32x32xf32>
    %c0_19 = arith.constant 0 : index
    %c1 = arith.constant 1 : index
    %c0_20 = arith.constant 0 : index
    %c0_21 = arith.constant 0 : index
    %35 = vector.load %arg11[%c0_19, %c1, %c0_20, %c0_21] : memref<4x2x32x96xf32, #tpu.memory_space<vmem>>, vector<1x1x32x96xf32>
    %36 = vector.shape_cast %35 : vector<1x1x32x96xf32> to vector<32x96xf32>
    %cst_22 = arith.constant dense<0.000000e+00> : vector<32x96xf32>
    %37 = tpu.matmul %34, %36, %cst_22 {dimension_numbers = #tpu.dot_dimension_numbers<[1], [0], [0], [1], [0, 0, 1, 1], [], []>} : vector<32x32xf32>, vector<32x96xf32>, vector<32x96xf32> -> vector<32x96xf32>
    %38 = vector.extract_strided_slice %37 {offsets = [0, 0], sizes = [32, 32], strides = [1, 1]} : vector<32x96xf32> to vector<32x32xf32>
    %39 = vector.shape_cast %38 : vector<32x32xf32> to vector<4x8x32xf32>
    %40 = vector.extract_strided_slice %37 {offsets = [0, 32], sizes = [32, 32], strides = [1, 1]} : vector<32x96xf32> to vector<32x32xf32>
    %41 = vector.shape_cast %40 : vector<32x32xf32> to vector<4x8x32xf32>
    %42 = vector.extract_strided_slice %37 {offsets = [0, 64], sizes = [32, 32], strides = [1, 1]} : vector<32x96xf32> to vector<32x32xf32>
    %43 = vector.shape_cast %42 : vector<32x32xf32> to vector<4x8x32xf32>
    "tpu.trace_start"() <{level = 10 : i32, message = "mtd,msd->mts"}> : () -> ()
    %cst_23 = arith.constant dense<0.000000e+00> : vector<4x8x8xf32>
    %44 = tpu.matmul %39, %41, %cst_23 {dimension_numbers = #tpu.dot_dimension_numbers<[2], [2], [1], [1], [0, 0, 0, 1, 1, 1], [0], [0]>} : vector<4x8x32xf32>, vector<4x8x32xf32>, vector<4x8x8xf32> -> vector<4x8x8xf32>
    "tpu.trace_stop"() : () -> ()
    %cst_24 = arith.constant 0.176776692 : f32
    %45 = vector.broadcast %cst_24 : f32 to vector<4x8x8xf32>
    %46 = arith.mulf %44, %45 : vector<4x8x8xf32>
    %47 = arith.addf %46, %9 : vector<4x8x8xf32>
    %cst_25 = arith.constant dense<0xFF800000> : vector<4x8xf32>
    %48 = vector.multi_reduction <maximumf>, %47, %cst_25 [2] : vector<4x8x8xf32> to vector<4x8xf32>
    %49 = vector.shape_cast %48 : vector<4x8xf32> to vector<4x8x1xf32>
    %50 = vector.broadcast %49 : vector<4x8x1xf32> to vector<4x8x8xf32>
    %51 = arith.subf %47, %50 : vector<4x8x8xf32>
    %52 = math.exp %51 : vector<4x8x8xf32>
    %cst_26 = arith.constant dense<0.000000e+00> : vector<4x8xf32>
    %53 = vector.multi_reduction <add>, %52, %cst_26 [2] : vector<4x8x8xf32> to vector<4x8xf32>
    %54 = vector.shape_cast %53 : vector<4x8xf32> to vector<4x8x1xf32>
    %55 = tpu.reciprocal %54 {approx = true} : vector<4x8x1xf32> -> vector<4x8x1xf32>
    %56 = vector.broadcast %55 : vector<4x8x1xf32> to vector<4x8x8xf32>
    %57 = arith.mulf %52, %56 : vector<4x8x8xf32>
    "tpu.trace_start"() <{level = 10 : i32, message = "mts,msd->mtd"}> : () -> ()
    %cst_27 = arith.constant dense<0.000000e+00> : vector<4x8x32xf32>
    %58 = tpu.matmul %57, %43, %cst_27 {dimension_numbers = #tpu.dot_dimension_numbers<[2], [1], [1], [2], [0, 0, 0, 1, 1, 2], [0], [0]>} : vector<4x8x8xf32>, vector<4x8x32xf32>, vector<4x8x32xf32> -> vector<4x8x32xf32>
    "tpu.trace_stop"() : () -> ()
    %59 = vector.shape_cast %58 : vector<4x8x32xf32> to vector<32x32xf32>
    %60 = vector.shape_cast %59 : vector<32x32xf32> to vector<4x8x32xf32>
    %c0_28 = arith.constant 0 : index
    %c0_29 = arith.constant 0 : index
    %c0_30 = arith.constant 0 : index
    %61 = vector.load %arg7[%c0_28, %c0_29, %c0_30] : memref<1x4x8xf32, #tpu.memory_space<vmem>>, vector<1x4x8xf32>
    %62 = vector.shape_cast %61 : vector<1x4x8xf32> to vector<4x8xf32>
    %63 = vector.shape_cast %62 : vector<4x8xf32> to vector<4x8x1xf32>
    %64 = vector.broadcast %63 : vector<4x8x1xf32> to vector<4x8x32xf32>
    %65 = arith.addf %60, %64 : vector<4x8x32xf32>
    %cst_31 = arith.constant dense<0xFF800000> : vector<4x32xf32>
    %66 = vector.multi_reduction <maximumf>, %65, %cst_31 [1] : vector<4x8x32xf32> to vector<4x32xf32>
    %c0_32 = arith.constant 0 : index
    %c0_33 = arith.constant 0 : index
    %c0_34 = arith.constant 0 : index
    %67 = vector.load %arg3[%c0_32, %c0_33, %c0_34] : memref<1x8x32xf32, #tpu.memory_space<vmem>>, vector<1x8x32xf32>
    %68 = vector.shape_cast %67 : vector<1x8x32xf32> to vector<8x32xf32>
    %c0_35 = arith.constant 0 : index
    %c0_36 = arith.constant 0 : index
    %c0_37 = arith.constant 0 : index
    %69 = vector.load %arg8[%c0_35, %c0_36, %c0_37] : memref<1x4x8xf32, #tpu.memory_space<vmem>>, vector<1x4x8xf32>
    %70 = vector.shape_cast %69 : vector<1x4x8xf32> to vector<4x8xf32>
    %c1_38 = arith.constant 1 : index
    %c0_39 = arith.constant 0 : index
    %c0_40 = arith.constant 0 : index
    %c0_41 = arith.constant 0 : index
    %71 = vector.load %arg11[%c1_38, %c0_39, %c0_40, %c0_41] : memref<4x2x32x96xf32, #tpu.memory_space<vmem>>, vector<1x1x32x96xf32>
    %72 = vector.shape_cast %71 : vector<1x1x32x96xf32> to vector<32x96xf32>
    %73 = vector.extract_strided_slice %72 {offsets = [0, 0], sizes = [32, 32], strides = [1, 1]} : vector<32x96xf32> to vector<32x32xf32>
    %cst_42 = arith.constant dense<0.000000e+00> : vector<4x32xf32>
    %74 = tpu.matmul %66, %73, %cst_42 {dimension_numbers = #tpu.dot_dimension_numbers<[1], [0], [0], [1], [0, 0, 1, 1], [], []>} : vector<4x32xf32>, vector<32x32xf32>, vector<4x32xf32> -> vector<4x32xf32>
    %75 = vector.extract_strided_slice %72 {offsets = [0, 32], sizes = [32, 64], strides = [1, 1]} : vector<32x96xf32> to vector<32x64xf32>
    %cst_43 = arith.constant dense<0.000000e+00> : vector<8x64xf32>
    %76 = tpu.matmul %68, %75, %cst_43 {dimension_numbers = #tpu.dot_dimension_numbers<[1], [0], [0], [1], [0, 0, 1, 1], [], []>} : vector<8x32xf32>, vector<32x64xf32>, vector<8x64xf32> -> vector<8x64xf32>
    %77 = vector.extract_strided_slice %76 {offsets = [0, 0], sizes = [8, 32], strides = [1, 1]} : vector<8x64xf32> to vector<8x32xf32>
    %78 = vector.extract_strided_slice %76 {offsets = [0, 32], sizes = [8, 32], strides = [1, 1]} : vector<8x64xf32> to vector<8x32xf32>
    %cst_44 = arith.constant dense<0.000000e+00> : vector<4x8xf32>
    %79 = tpu.matmul %74, %77, %cst_44 {dimension_numbers = #tpu.dot_dimension_numbers<[1], [1], [0], [0], [0, 0, 1, 0], [], []>} : vector<4x32xf32>, vector<8x32xf32>, vector<4x8xf32> -> vector<4x8xf32>
    %cst_45 = arith.constant 0.176776692 : f32
    %80 = vector.broadcast %cst_45 : f32 to vector<4x8xf32>
    %81 = arith.mulf %79, %80 : vector<4x8xf32>
    %82 = arith.addf %81, %70 : vector<4x8xf32>
    %cst_46 = arith.constant dense<0xFF800000> : vector<4xf32>
    %83 = vector.multi_reduction <maximumf>, %82, %cst_46 [1] : vector<4x8xf32> to vector<4xf32>
    %84 = vector.shape_cast %83 : vector<4xf32> to vector<4x1xf32>
    %85 = vector.broadcast %84 : vector<4x1xf32> to vector<4x8xf32>
    %86 = arith.subf %82, %85 : vector<4x8xf32>
    %87 = math.exp %86 : vector<4x8xf32>
    %cst_47 = arith.constant dense<0.000000e+00> : vector<4xf32>
    %88 = vector.multi_reduction <add>, %87, %cst_47 [1] : vector<4x8xf32> to vector<4xf32>
    %89 = vector.shape_cast %88 : vector<4xf32> to vector<4x1xf32>
    %90 = tpu.reciprocal %89 {approx = true} : vector<4x1xf32> -> vector<4x1xf32>
    %91 = vector.broadcast %90 : vector<4x1xf32> to vector<4x8xf32>
    %92 = arith.mulf %87, %91 : vector<4x8xf32>
    %cst_48 = arith.constant dense<0.000000e+00> : vector<4x32xf32>
    %93 = tpu.matmul %92, %78, %cst_48 {dimension_numbers = #tpu.dot_dimension_numbers<[1], [0], [0], [1], [0, 0, 1, 1], [], []>} : vector<4x8xf32>, vector<8x32xf32>, vector<4x32xf32> -> vector<4x32xf32>
    %c1_49 = arith.constant 1 : index
    %c1_50 = arith.constant 1 : index
    %c0_51 = arith.constant 0 : index
    %c0_52 = arith.constant 0 : index
    %94 = vector.load %arg11[%c1_49, %c1_50, %c0_51, %c0_52] : memref<4x2x32x96xf32, #tpu.memory_space<vmem>>, vector<1x1x32x96xf32>
    %95 = vector.shape_cast %94 : vector<1x1x32x96xf32> to vector<32x96xf32>
    %96 = vector.extract_strided_slice %95 {offsets = [0, 0], sizes = [32, 32], strides = [1, 1]} : vector<32x96xf32> to vector<32x32xf32>
    %cst_53 = arith.constant dense<0.000000e+00> : vector<4x32xf32>
    %97 = tpu.matmul %93, %96, %cst_53 {dimension_numbers = #tpu.dot_dimension_numbers<[1], [0], [0], [1], [0, 0, 1, 1], [], []>} : vector<4x32xf32>, vector<32x32xf32>, vector<4x32xf32> -> vector<4x32xf32>
    %98 = vector.extract_strided_slice %95 {offsets = [0, 32], sizes = [32, 64], strides = [1, 1]} : vector<32x96xf32> to vector<32x64xf32>
    %cst_54 = arith.constant dense<0.000000e+00> : vector<8x64xf32>
    %99 = tpu.matmul %68, %98, %cst_54 {dimension_numbers = #tpu.dot_dimension_numbers<[1], [0], [0], [1], [0, 0, 1, 1], [], []>} : vector<8x32xf32>, vector<32x64xf32>, vector<8x64xf32> -> vector<8x64xf32>
    %100 = vector.extract_strided_slice %99 {offsets = [0, 0], sizes = [8, 32], strides = [1, 1]} : vector<8x64xf32> to vector<8x32xf32>
    %101 = vector.extract_strided_slice %99 {offsets = [0, 32], sizes = [8, 32], strides = [1, 1]} : vector<8x64xf32> to vector<8x32xf32>
    %cst_55 = arith.constant dense<0.000000e+00> : vector<4x8xf32>
    %102 = tpu.matmul %97, %100, %cst_55 {dimension_numbers = #tpu.dot_dimension_numbers<[1], [1], [0], [0], [0, 0, 1, 0], [], []>} : vector<4x32xf32>, vector<8x32xf32>, vector<4x8xf32> -> vector<4x8xf32>
    %cst_56 = arith.constant 0.176776692 : f32
    %103 = vector.broadcast %cst_56 : f32 to vector<4x8xf32>
    %104 = arith.mulf %102, %103 : vector<4x8xf32>
    %105 = arith.addf %104, %70 : vector<4x8xf32>
    %cst_57 = arith.constant dense<0xFF800000> : vector<4xf32>
    %106 = vector.multi_reduction <maximumf>, %105, %cst_57 [1] : vector<4x8xf32> to vector<4xf32>
    %107 = vector.shape_cast %106 : vector<4xf32> to vector<4x1xf32>
    %108 = vector.broadcast %107 : vector<4x1xf32> to vector<4x8xf32>
    %109 = arith.subf %105, %108 : vector<4x8xf32>
    %110 = math.exp %109 : vector<4x8xf32>
    %cst_58 = arith.constant dense<0.000000e+00> : vector<4xf32>
    %111 = vector.multi_reduction <add>, %110, %cst_58 [1] : vector<4x8xf32> to vector<4xf32>
    %112 = vector.shape_cast %111 : vector<4xf32> to vector<4x1xf32>
    %113 = tpu.reciprocal %112 {approx = true} : vector<4x1xf32> -> vector<4x1xf32>
    %114 = vector.broadcast %113 : vector<4x1xf32> to vector<4x8xf32>
    %115 = arith.mulf %110, %114 : vector<4x8xf32>
    %cst_59 = arith.constant dense<0.000000e+00> : vector<4x32xf32>
    %116 = tpu.matmul %115, %101, %cst_59 {dimension_numbers = #tpu.dot_dimension_numbers<[1], [0], [0], [1], [0, 0, 1, 1], [], []>} : vector<4x8xf32>, vector<8x32xf32>, vector<4x32xf32> -> vector<4x32xf32>
    %c0_60 = arith.constant 0 : index
    %c0_61 = arith.constant 0 : index
    %c0_62 = arith.constant 0 : index
    %117 = vector.load %arg4[%c0_60, %c0_61, %c0_62] : memref<1x8x32xf32, #tpu.memory_space<vmem>>, vector<1x8x32xf32>
    %118 = vector.shape_cast %117 : vector<1x8x32xf32> to vector<8x32xf32>
    %c0_63 = arith.constant 0 : index
    %c0_64 = arith.constant 0 : index
    %c0_65 = arith.constant 0 : index
    %119 = vector.load %arg9[%c0_63, %c0_64, %c0_65] : memref<1x4x8xf32, #tpu.memory_space<vmem>>, vector<1x4x8xf32>
    %120 = vector.shape_cast %119 : vector<1x4x8xf32> to vector<4x8xf32>
    %c2 = arith.constant 2 : index
    %c0_66 = arith.constant 0 : index
    %c0_67 = arith.constant 0 : index
    %c0_68 = arith.constant 0 : index
    %121 = vector.load %arg11[%c2, %c0_66, %c0_67, %c0_68] : memref<4x2x32x96xf32, #tpu.memory_space<vmem>>, vector<1x1x32x96xf32>
    %122 = vector.shape_cast %121 : vector<1x1x32x96xf32> to vector<32x96xf32>
    %123 = vector.extract_strided_slice %122 {offsets = [0, 0], sizes = [32, 32], strides = [1, 1]} : vector<32x96xf32> to vector<32x32xf32>
    %cst_69 = arith.constant dense<0.000000e+00> : vector<4x32xf32>
    %124 = tpu.matmul %116, %123, %cst_69 {dimension_numbers = #tpu.dot_dimension_numbers<[1], [0], [0], [1], [0, 0, 1, 1], [], []>} : vector<4x32xf32>, vector<32x32xf32>, vector<4x32xf32> -> vector<4x32xf32>
    %125 = vector.extract_strided_slice %122 {offsets = [0, 32], sizes = [32, 64], strides = [1, 1]} : vector<32x96xf32> to vector<32x64xf32>
    %cst_70 = arith.constant dense<0.000000e+00> : vector<8x64xf32>
    %126 = tpu.matmul %118, %125, %cst_70 {dimension_numbers = #tpu.dot_dimension_numbers<[1], [0], [0], [1], [0, 0, 1, 1], [], []>} : vector<8x32xf32>, vector<32x64xf32>, vector<8x64xf32> -> vector<8x64xf32>
    %127 = vector.extract_strided_slice %126 {offsets = [0, 0], sizes = [8, 32], strides = [1, 1]} : vector<8x64xf32> to vector<8x32xf32>
    %128 = vector.extract_strided_slice %126 {offsets = [0, 32], sizes = [8, 32], strides = [1, 1]} : vector<8x64xf32> to vector<8x32xf32>
    %cst_71 = arith.constant dense<0.000000e+00> : vector<4x8xf32>
    %129 = tpu.matmul %124, %127, %cst_71 {dimension_numbers = #tpu.dot_dimension_numbers<[1], [1], [0], [0], [0, 0, 1, 0], [], []>} : vector<4x32xf32>, vector<8x32xf32>, vector<4x8xf32> -> vector<4x8xf32>
    %cst_72 = arith.constant 0.176776692 : f32
    %130 = vector.broadcast %cst_72 : f32 to vector<4x8xf32>
    %131 = arith.mulf %129, %130 : vector<4x8xf32>
    %132 = arith.addf %131, %120 : vector<4x8xf32>
    %cst_73 = arith.constant dense<0xFF800000> : vector<4xf32>
    %133 = vector.multi_reduction <maximumf>, %132, %cst_73 [1] : vector<4x8xf32> to vector<4xf32>
    %134 = vector.shape_cast %133 : vector<4xf32> to vector<4x1xf32>
    %135 = vector.broadcast %134 : vector<4x1xf32> to vector<4x8xf32>
    %136 = arith.subf %132, %135 : vector<4x8xf32>
    %137 = math.exp %136 : vector<4x8xf32>
    %cst_74 = arith.constant dense<0.000000e+00> : vector<4xf32>
    %138 = vector.multi_reduction <add>, %137, %cst_74 [1] : vector<4x8xf32> to vector<4xf32>
    %139 = vector.shape_cast %138 : vector<4xf32> to vector<4x1xf32>
    %140 = tpu.reciprocal %139 {approx = true} : vector<4x1xf32> -> vector<4x1xf32>
    %141 = vector.broadcast %140 : vector<4x1xf32> to vector<4x8xf32>
    %142 = arith.mulf %137, %141 : vector<4x8xf32>
    %cst_75 = arith.constant dense<0.000000e+00> : vector<4x32xf32>
    %143 = tpu.matmul %142, %128, %cst_75 {dimension_numbers = #tpu.dot_dimension_numbers<[1], [0], [0], [1], [0, 0, 1, 1], [], []>} : vector<4x8xf32>, vector<8x32xf32>, vector<4x32xf32> -> vector<4x32xf32>
    %c2_76 = arith.constant 2 : index
    %c1_77 = arith.constant 1 : index
    %c0_78 = arith.constant 0 : index
    %c0_79 = arith.constant 0 : index
    %144 = vector.load %arg11[%c2_76, %c1_77, %c0_78, %c0_79] : memref<4x2x32x96xf32, #tpu.memory_space<vmem>>, vector<1x1x32x96xf32>
    %145 = vector.shape_cast %144 : vector<1x1x32x96xf32> to vector<32x96xf32>
    %146 = vector.extract_strided_slice %145 {offsets = [0, 0], sizes = [32, 32], strides = [1, 1]} : vector<32x96xf32> to vector<32x32xf32>
    %cst_80 = arith.constant dense<0.000000e+00> : vector<4x32xf32>
    %147 = tpu.matmul %143, %146, %cst_80 {dimension_numbers = #tpu.dot_dimension_numbers<[1], [0], [0], [1], [0, 0, 1, 1], [], []>} : vector<4x32xf32>, vector<32x32xf32>, vector<4x32xf32> -> vector<4x32xf32>
    %148 = vector.extract_strided_slice %145 {offsets = [0, 32], sizes = [32, 64], strides = [1, 1]} : vector<32x96xf32> to vector<32x64xf32>
    %cst_81 = arith.constant dense<0.000000e+00> : vector<8x64xf32>
    %149 = tpu.matmul %118, %148, %cst_81 {dimension_numbers = #tpu.dot_dimension_numbers<[1], [0], [0], [1], [0, 0, 1, 1], [], []>} : vector<8x32xf32>, vector<32x64xf32>, vector<8x64xf32> -> vector<8x64xf32>
    %150 = vector.extract_strided_slice %149 {offsets = [0, 0], sizes = [8, 32], strides = [1, 1]} : vector<8x64xf32> to vector<8x32xf32>
    %151 = vector.extract_strided_slice %149 {offsets = [0, 32], sizes = [8, 32], strides = [1, 1]} : vector<8x64xf32> to vector<8x32xf32>
    %cst_82 = arith.constant dense<0.000000e+00> : vector<4x8xf32>
    %152 = tpu.matmul %147, %150, %cst_82 {dimension_numbers = #tpu.dot_dimension_numbers<[1], [1], [0], [0], [0, 0, 1, 0], [], []>} : vector<4x32xf32>, vector<8x32xf32>, vector<4x8xf32> -> vector<4x8xf32>
    %cst_83 = arith.constant 0.176776692 : f32
    %153 = vector.broadcast %cst_83 : f32 to vector<4x8xf32>
    %154 = arith.mulf %152, %153 : vector<4x8xf32>
    %155 = arith.addf %154, %120 : vector<4x8xf32>
    %cst_84 = arith.constant dense<0xFF800000> : vector<4xf32>
    %156 = vector.multi_reduction <maximumf>, %155, %cst_84 [1] : vector<4x8xf32> to vector<4xf32>
    %157 = vector.shape_cast %156 : vector<4xf32> to vector<4x1xf32>
    %158 = vector.broadcast %157 : vector<4x1xf32> to vector<4x8xf32>
    %159 = arith.subf %155, %158 : vector<4x8xf32>
    %160 = math.exp %159 : vector<4x8xf32>
    %cst_85 = arith.constant dense<0.000000e+00> : vector<4xf32>
    %161 = vector.multi_reduction <add>, %160, %cst_85 [1] : vector<4x8xf32> to vector<4xf32>
    %162 = vector.shape_cast %161 : vector<4xf32> to vector<4x1xf32>
    %163 = tpu.reciprocal %162 {approx = true} : vector<4x1xf32> -> vector<4x1xf32>
    %164 = vector.broadcast %163 : vector<4x1xf32> to vector<4x8xf32>
    %165 = arith.mulf %160, %164 : vector<4x8xf32>
    %cst_86 = arith.constant dense<0.000000e+00> : vector<4x32xf32>
    %166 = tpu.matmul %165, %151, %cst_86 {dimension_numbers = #tpu.dot_dimension_numbers<[1], [0], [0], [1], [0, 0, 1, 1], [], []>} : vector<4x8xf32>, vector<8x32xf32>, vector<4x32xf32> -> vector<4x32xf32>
    %c0_87 = arith.constant 0 : index
    %c0_88 = arith.constant 0 : index
    %c0_89 = arith.constant 0 : index
    %167 = vector.load %arg5[%c0_87, %c0_88, %c0_89] : memref<1x16x32xf32, #tpu.memory_space<vmem>>, vector<1x16x32xf32>
    %168 = vector.shape_cast %167 : vector<1x16x32xf32> to vector<16x32xf32>
    %c0_90 = arith.constant 0 : index
    %c0_91 = arith.constant 0 : index
    %c0_92 = arith.constant 0 : index
    %169 = vector.load %arg10[%c0_90, %c0_91, %c0_92] : memref<1x4x16xf32, #tpu.memory_space<vmem>>, vector<1x4x16xf32>
    %170 = vector.shape_cast %169 : vector<1x4x16xf32> to vector<4x16xf32>
    %c3 = arith.constant 3 : index
    %c0_93 = arith.constant 0 : index
    %c0_94 = arith.constant 0 : index
    %c0_95 = arith.constant 0 : index
    %171 = vector.load %arg11[%c3, %c0_93, %c0_94, %c0_95] : memref<4x2x32x96xf32, #tpu.memory_space<vmem>>, vector<1x1x32x96xf32>
    %172 = vector.shape_cast %171 : vector<1x1x32x96xf32> to vector<32x96xf32>
    %173 = vector.extract_strided_slice %172 {offsets = [0, 0], sizes = [32, 32], strides = [1, 1]} : vector<32x96xf32> to vector<32x32xf32>
    %cst_96 = arith.constant dense<0.000000e+00> : vector<4x32xf32>
    %174 = tpu.matmul %166, %173, %cst_96 {dimension_numbers = #tpu.dot_dimension_numbers<[1], [0], [0], [1], [0, 0, 1, 1], [], []>} : vector<4x32xf32>, vector<32x32xf32>, vector<4x32xf32> -> vector<4x32xf32>
    %175 = vector.extract_strided_slice %172 {offsets = [0, 32], sizes = [32, 64], strides = [1, 1]} : vector<32x96xf32> to vector<32x64xf32>
    %cst_97 = arith.constant dense<0.000000e+00> : vector<16x64xf32>
    %176 = tpu.matmul %168, %175, %cst_97 {dimension_numbers = #tpu.dot_dimension_numbers<[1], [0], [0], [1], [0, 0, 1, 1], [], []>} : vector<16x32xf32>, vector<32x64xf32>, vector<16x64xf32> -> vector<16x64xf32>
    %177 = vector.extract_strided_slice %176 {offsets = [0, 0], sizes = [16, 32], strides = [1, 1]} : vector<16x64xf32> to vector<16x32xf32>
    %178 = vector.extract_strided_slice %176 {offsets = [0, 32], sizes = [16, 32], strides = [1, 1]} : vector<16x64xf32> to vector<16x32xf32>
    %cst_98 = arith.constant dense<0.000000e+00> : vector<4x16xf32>
    %179 = tpu.matmul %174, %177, %cst_98 {dimension_numbers = #tpu.dot_dimension_numbers<[1], [1], [0], [0], [0, 0, 1, 0], [], []>} : vector<4x32xf32>, vector<16x32xf32>, vector<4x16xf32> -> vector<4x16xf32>
    %cst_99 = arith.constant 0.176776692 : f32
    %180 = vector.broadcast %cst_99 : f32 to vector<4x16xf32>
    %181 = arith.mulf %179, %180 : vector<4x16xf32>
    %182 = arith.addf %181, %170 : vector<4x16xf32>
    %cst_100 = arith.constant dense<0xFF800000> : vector<4xf32>
    %183 = vector.multi_reduction <maximumf>, %182, %cst_100 [1] : vector<4x16xf32> to vector<4xf32>
    %184 = vector.shape_cast %183 : vector<4xf32> to vector<4x1xf32>
    %185 = vector.broadcast %184 : vector<4x1xf32> to vector<4x16xf32>
    %186 = arith.subf %182, %185 : vector<4x16xf32>
    %187 = math.exp %186 : vector<4x16xf32>
    %cst_101 = arith.constant dense<0.000000e+00> : vector<4xf32>
    %188 = vector.multi_reduction <add>, %187, %cst_101 [1] : vector<4x16xf32> to vector<4xf32>
    %189 = vector.shape_cast %188 : vector<4xf32> to vector<4x1xf32>
    %190 = tpu.reciprocal %189 {approx = true} : vector<4x1xf32> -> vector<4x1xf32>
    %191 = vector.broadcast %190 : vector<4x1xf32> to vector<4x16xf32>
    %192 = arith.mulf %187, %191 : vector<4x16xf32>
    %cst_102 = arith.constant dense<0.000000e+00> : vector<4x32xf32>
    %193 = tpu.matmul %192, %178, %cst_102 {dimension_numbers = #tpu.dot_dimension_numbers<[1], [0], [0], [1], [0, 0, 1, 1], [], []>} : vector<4x16xf32>, vector<16x32xf32>, vector<4x32xf32> -> vector<4x32xf32>
    %c3_103 = arith.constant 3 : index
    %c1_104 = arith.constant 1 : index
    %c0_105 = arith.constant 0 : index
    %c0_106 = arith.constant 0 : index
    %194 = vector.load %arg11[%c3_103, %c1_104, %c0_105, %c0_106] : memref<4x2x32x96xf32, #tpu.memory_space<vmem>>, vector<1x1x32x96xf32>
    %195 = vector.shape_cast %194 : vector<1x1x32x96xf32> to vector<32x96xf32>
    %196 = vector.extract_strided_slice %195 {offsets = [0, 0], sizes = [32, 32], strides = [1, 1]} : vector<32x96xf32> to vector<32x32xf32>
    %cst_107 = arith.constant dense<0.000000e+00> : vector<4x32xf32>
    %197 = tpu.matmul %193, %196, %cst_107 {dimension_numbers = #tpu.dot_dimension_numbers<[1], [0], [0], [1], [0, 0, 1, 1], [], []>} : vector<4x32xf32>, vector<32x32xf32>, vector<4x32xf32> -> vector<4x32xf32>
    %198 = vector.extract_strided_slice %195 {offsets = [0, 32], sizes = [32, 64], strides = [1, 1]} : vector<32x96xf32> to vector<32x64xf32>
    %cst_108 = arith.constant dense<0.000000e+00> : vector<16x64xf32>
    %199 = tpu.matmul %168, %198, %cst_108 {dimension_numbers = #tpu.dot_dimension_numbers<[1], [0], [0], [1], [0, 0, 1, 1], [], []>} : vector<16x32xf32>, vector<32x64xf32>, vector<16x64xf32> -> vector<16x64xf32>
    %200 = vector.extract_strided_slice %199 {offsets = [0, 0], sizes = [16, 32], strides = [1, 1]} : vector<16x64xf32> to vector<16x32xf32>
    %201 = vector.extract_strided_slice %199 {offsets = [0, 32], sizes = [16, 32], strides = [1, 1]} : vector<16x64xf32> to vector<16x32xf32>
    %cst_109 = arith.constant dense<0.000000e+00> : vector<4x16xf32>
    %202 = tpu.matmul %197, %200, %cst_109 {dimension_numbers = #tpu.dot_dimension_numbers<[1], [1], [0], [0], [0, 0, 1, 0], [], []>} : vector<4x32xf32>, vector<16x32xf32>, vector<4x16xf32> -> vector<4x16xf32>
    %cst_110 = arith.constant 0.176776692 : f32
    %203 = vector.broadcast %cst_110 : f32 to vector<4x16xf32>
    %204 = arith.mulf %202, %203 : vector<4x16xf32>
    %205 = arith.addf %204, %170 : vector<4x16xf32>
    %cst_111 = arith.constant dense<0xFF800000> : vector<4xf32>
    %206 = vector.multi_reduction <maximumf>, %205, %cst_111 [1] : vector<4x16xf32> to vector<4xf32>
    %207 = vector.shape_cast %206 : vector<4xf32> to vector<4x1xf32>
    %208 = vector.broadcast %207 : vector<4x1xf32> to vector<4x16xf32>
    %209 = arith.subf %205, %208 : vector<4x16xf32>
    %210 = math.exp %209 : vector<4x16xf32>
    %cst_112 = arith.constant dense<0.000000e+00> : vector<4xf32>
    %211 = vector.multi_reduction <add>, %210, %cst_112 [1] : vector<4x16xf32> to vector<4xf32>
    %212 = vector.shape_cast %211 : vector<4xf32> to vector<4x1xf32>
    %213 = tpu.reciprocal %212 {approx = true} : vector<4x1xf32> -> vector<4x1xf32>
    %214 = vector.broadcast %213 : vector<4x1xf32> to vector<4x16xf32>
    %215 = arith.mulf %210, %214 : vector<4x16xf32>
    %cst_113 = arith.constant dense<0.000000e+00> : vector<4x32xf32>
    %216 = tpu.matmul %215, %201, %cst_113 {dimension_numbers = #tpu.dot_dimension_numbers<[1], [0], [0], [1], [0, 0, 1, 1], [], []>} : vector<4x16xf32>, vector<16x32xf32>, vector<4x32xf32> -> vector<4x32xf32>
    %217 = vector.shape_cast %216 : vector<4x32xf32> to vector<4x1x32xf32>
    %218 = vector.broadcast %217 : vector<4x1x32xf32> to vector<4x8x32xf32>
    %219 = arith.addf %1, %218 : vector<4x8x32xf32>
    %cst_114 = arith.constant dense<0.000000e+00> : vector<4x8xf32>
    %220 = vector.multi_reduction <add>, %219, %cst_114 [2] : vector<4x8x32xf32> to vector<4x8xf32>
    %221 = vector.shape_cast %220 : vector<4x8xf32> to vector<4x8x1xf32>
    %cst_115 = arith.constant 3.200000e+01 : f32
    %222 = vector.broadcast %cst_115 : f32 to vector<4x8x1xf32>
    %223 = arith.divf %221, %222 : vector<4x8x1xf32>
    %224 = vector.broadcast %223 : vector<4x8x1xf32> to vector<4x8x32xf32>
    %225 = arith.subf %219, %224 : vector<4x8x32xf32>
    %226 = arith.mulf %225, %225 : vector<4x8x32xf32>
    %cst_116 = arith.constant dense<0.000000e+00> : vector<4x8xf32>
    %227 = vector.multi_reduction <add>, %226, %cst_116 [2] : vector<4x8x32xf32> to vector<4x8xf32>
    %228 = vector.shape_cast %227 : vector<4x8xf32> to vector<4x8x1xf32>
    %cst_117 = arith.constant 3.200000e+01 : f32
    %229 = vector.broadcast %cst_117 : f32 to vector<4x8x1xf32>
    %230 = arith.divf %228, %229 : vector<4x8x1xf32>
    %231 = vector.broadcast %223 : vector<4x8x1xf32> to vector<4x8x32xf32>
    %232 = arith.subf %219, %231 : vector<4x8x32xf32>
    %cst_118 = arith.constant 9.99999974E-6 : f32
    %233 = vector.broadcast %cst_118 : f32 to vector<4x8x1xf32>
    %234 = arith.addf %230, %233 : vector<4x8x1xf32>
    %235 = math.rsqrt %234 : vector<4x8x1xf32>
    %236 = vector.broadcast %235 : vector<4x8x1xf32> to vector<4x8x32xf32>
    %237 = arith.mulf %232, %236 : vector<4x8x32xf32>
    %c0_119 = arith.constant 0 : index
    %c0_120 = arith.constant 0 : index
    %238 = vector.load %arg12[%c0_119, %c0_120] : memref<1x32xf32, #tpu.memory_space<vmem>>, vector<1x32xf32>
    %239 = vector.shape_cast %238 : vector<1x32xf32> to vector<1x1x32xf32>
    %240 = vector.broadcast %239 : vector<1x1x32xf32> to vector<4x8x32xf32>
    %241 = arith.mulf %237, %240 : vector<4x8x32xf32>
    %c0_121 = arith.constant 0 : index
    %c0_122 = arith.constant 0 : index
    %242 = vector.load %arg13[%c0_121, %c0_122] : memref<1x32xf32, #tpu.memory_space<vmem>>, vector<1x32xf32>
    %243 = vector.shape_cast %242 : vector<1x32xf32> to vector<1x1x32xf32>
    %244 = vector.broadcast %243 : vector<1x1x32xf32> to vector<4x8x32xf32>
    %245 = arith.addf %241, %244 : vector<4x8x32xf32>
    %c0_123 = arith.constant 0 : index
    %c0_124 = arith.constant 0 : index
    %c0_125 = arith.constant 0 : index
    %c0_126 = arith.constant 0 : index
    %246 = vector.load %arg14[%c0_123, %c0_124, %c0_125, %c0_126] : memref<1x4x8x32xf32, #tpu.memory_space<vmem>>, vector<1x4x8x32xf32>
    %247 = vector.shape_cast %246 : vector<1x4x8x32xf32> to vector<4x8x32xf32>
    %248 = vector.shape_cast %245 : vector<4x8x32xf32> to vector<1x4x8x32xf32>
    tpu.vector_store %arg14[%c0_123, %c0_124, %c0_125, %c0_126], %248 {strides = array<i32>} : memref<1x4x8x32xf32, #tpu.memory_space<vmem>>, vector<1x4x8x32xf32>,
    return
  }
  func.func @transform_0(%arg0: i32) -> (i32, i32, i32, i32) {
    %c0_i32 = arith.constant 0 : i32
    %c0_i32_0 = arith.constant 0 : i32
    %c0_i32_1 = arith.constant 0 : i32
    %c0_i32_2 = arith.constant 0 : i32
    return %arg0, %c0_i32, %c0_i32_0, %c0_i32_1 : i32, i32, i32, i32
  }
  func.func @transform_1(%arg0: i32) -> (i32, i32, i32) {
    %c0_i32 = arith.constant 0 : i32
    %c0_i32_0 = arith.constant 0 : i32
    %c0_i32_1 = arith.constant 0 : i32
    return %arg0, %c0_i32, %c0_i32_0 : i32, i32, i32
  }
  func.func @transform_2(%arg0: i32) -> (i32, i32, i32) {
    %c0_i32 = arith.constant 0 : i32
    %c0_i32_0 = arith.constant 0 : i32
    %c0_i32_1 = arith.constant 0 : i32
    return %arg0, %c0_i32, %c0_i32_0 : i32, i32, i32
  }
  func.func @transform_3(%arg0: i32) -> (i32, i32, i32) {
    %c0_i32 = arith.constant 0 : i32
    %c0_i32_0 = arith.constant 0 : i32
    %c0_i32_1 = arith.constant 0 : i32
    return %arg0, %c0_i32, %c0_i32_0 : i32, i32, i32
  }
  func.func @transform_4(%arg0: i32) -> (i32, i32, i32) {
    %c0_i32 = arith.constant 0 : i32
    %c0_i32_0 = arith.constant 0 : i32
    %c0_i32_1 = arith.constant 0 : i32
    return %arg0, %c0_i32, %c0_i32_0 : i32, i32, i32
  }
  func.func @transform_5(%arg0: i32) -> (i32, i32, i32, i32) {
    %c0_i32 = arith.constant 0 : i32
    %c0_i32_0 = arith.constant 0 : i32
    %c0_i32_1 = arith.constant 0 : i32
    %c0_i32_2 = arith.constant 0 : i32
    return %arg0, %c0_i32, %c0_i32_0, %c0_i32_1 : i32, i32, i32, i32
  }
  func.func @transform_6(%arg0: i32) -> (i32, i32, i32) {
    %c0_i32 = arith.constant 0 : i32
    %c0_i32_0 = arith.constant 0 : i32
    %c0_i32_1 = arith.constant 0 : i32
    return %arg0, %c0_i32, %c0_i32_0 : i32, i32, i32
  }
  func.func @transform_7(%arg0: i32) -> (i32, i32, i32) {
    %c0_i32 = arith.constant 0 : i32
    %c0_i32_0 = arith.constant 0 : i32
    %c0_i32_1 = arith.constant 0 : i32
    return %arg0, %c0_i32, %c0_i32_0 : i32, i32, i32
  }
  func.func @transform_8(%arg0: i32) -> (i32, i32, i32) {
    %c0_i32 = arith.constant 0 : i32
    %c0_i32_0 = arith.constant 0 : i32
    %c0_i32_1 = arith.constant 0 : i32
    return %arg0, %c0_i32, %c0_i32_0 : i32, i32, i32
  }
  func.func @transform_9(%arg0: i32) -> (i32, i32, i32) {
    %c0_i32 = arith.constant 0 : i32
    %c0_i32_0 = arith.constant 0 : i32
    %c0_i32_1 = arith.constant 0 : i32
    return %arg0, %c0_i32, %c0_i32_0 : i32, i32, i32
  }
  func.func @transform_10(%arg0: i32) -> (i32, i32, i32, i32) {
    %c0_i32 = arith.constant 0 : i32
    %c0_i32_0 = arith.constant 0 : i32
    %c0_i32_1 = arith.constant 0 : i32
    %c0_i32_2 = arith.constant 0 : i32
    %c0_i32_3 = arith.constant 0 : i32
    return %c0_i32, %c0_i32_0, %c0_i32_1, %c0_i32_2 : i32, i32, i32, i32
  }
  func.func @transform_11(%arg0: i32) -> (i32, i32) {
    %c0_i32 = arith.constant 0 : i32
    %c0_i32_0 = arith.constant 0 : i32
    %c0_i32_1 = arith.constant 0 : i32
    return %c0_i32, %c0_i32_0 : i32, i32
  }
  func.func @transform_12(%arg0: i32) -> (i32, i32) {
    %c0_i32 = arith.constant 0 : i32
    %c0_i32_0 = arith.constant 0 : i32
    %c0_i32_1 = arith.constant 0 : i32
    return %c0_i32, %c0_i32_0 : i32, i32
  }
  func.func @transform_13(%arg0: i32) -> (i32, i32, i32, i32) {
    %c0_i32 = arith.constant 0 : i32
    %c0_i32_0 = arith.constant 0 : i32
    %c0_i32_1 = arith.constant 0 : i32
    %c0_i32_2 = arith.constant 0 : i32
    return %arg0, %c0_i32, %c0_i32_0, %c0_i32_1 : i32, i32, i32, i32
  }
}

</mosaic_0001>

<bundles_post_ra>
// kernel: tpu_custom_call.1
= control target key start
LH: loop header
LB: loop body
LE: loop exit
PB: predicated region body
PF: predicated region fallthrough
CT: control target
= control target key end

     0   :  { %s6907_s0 = inlined_call_operand.hbm [shape: f32[2,4,8,32], index: 0, kind: input, shape index: {}]   ;;  %s6908_s1 = inlined_call_operand.hbm [shape: f32[2,4,32], index: 1, kind: input, shape index: {}]   ;;  %s6909_s2 = inlined_call_operand.hbm [shape: f32[2,8,32], index: 2, kind: input, shape index: {}]   ;;  %s6910_s3 = inlined_call_operand.hbm [shape: f32[2,8,32], index: 3, kind: input, shape index: {}]   ;;  %s6911_s4 = inlined_call_operand.hbm [shape: f32[2,16,32], index: 4, kind: input, shape index: {}]   ;;  %s6912_s5 = inlined_call_operand.hbm [shape: f32[2,4,8,8], index: 5, kind: input, shape index: {}]   ;;  %s6913_s6 = inlined_call_operand.vmem [shape: f32[2,4,8], index: 6, kind: input, shape index: {}]   ;;  %s6914_s7 = inlined_call_operand.vmem [shape: f32[2,4,8], index: 7, kind: input, shape index: {}]   ;;  %s6915_s8 = inlined_call_operand.vmem [shape: f32[2,4,8], index: 8, kind: input, shape index: {}]   ;;  %s6916_s9 = inlined_call_operand.vmem [shape: f32[2,4,16], index: 9, kind: input, shape index: {}]   ;;  %s6917_s10 = inlined_call_operand.hbm [shape: f32[4,2,32,96], index: 10, kind: input, shape index: {}]   ;;  %s6918_s11 = inlined_call_operand.vmem [shape: f32[1,32], index: 11, kind: input, shape index: {}]   ;;  %s6919_s12 = inlined_call_operand.vmem [shape: f32[1,32], index: 12, kind: input, shape index: {}]   ;;  %s6920_s13 = inlined_call_operand.hbm [shape: f32[2,4,8,32], index: 13, kind: output, shape index: {}]  }
   0x1   :  { %6945 = sst [smem:[#allocation27_spill]] %s6907_s0 }
   0x2   :  { %6946 = sst [smem:[#allocation28_spill]] %s6908_s1 }
   0x3   :  { %6947 = sst [smem:[#allocation29_spill]] %s6910_s3 }
   0x4   :  { %6948 = sst [smem:[#allocation30_spill]] %s6915_s8 }
   0x5   :  { %6949 = sst [smem:[#allocation31_spill]] %s6916_s9 }
   0x6   :  { %6950 = sst [smem:[#allocation32_spill]] %s6917_s10 }
   0x7   :  { %6951 = sst [smem:[#allocation33_spill]] %s6918_s11 }
   0x8   :  { %6952 = sst [smem:[#allocation34_spill]] %s6919_s12 }
   0x9   :  { %6953 = sst [smem:[#allocation35_spill]] %s6920_s13 }
   0xa   :  { %18 = vsyncpa [#allocation3], 0 }
   0xb   :  { %20 = vsyncpa [#allocation3 + $0x1], 0 }
   0xc   :  { %21 = vsyncpa [#allocation6], 0 }
   0xd   :  { %23 = vsyncpa [#allocation6 + $0x1], 0 }
   0xe   :  { %24 = vsyncpa [#allocation9], 0 }
   0xf   :  { %26 = vsyncpa [#allocation9 + $0x1], 0 }
  0x10   :  { %27 = vsyncpa [#allocation12], 0 }
  0x11   :  { %29 = vsyncpa [#allocation12 + $0x1], 0 }
  0x12   :  { %30 = vsyncpa [#allocation4], 0 }
  0x13   :  { %32 = vsyncpa [#allocation4 + $0x1], 0  ;;  %s6054_s25 = smov 0   ;;  %s6056_s26 = smov 0  }
  0x14   :  { %s6058_s27 = smov 0   ;;  %s6060_s28 = smov 0  }
  0x15 LB: > { %6954 = sst [smem:[#allocation21_spill]] %s5952_s25  ;;  %s6075_s29 = sadd.s32 4294967295, %s5964_s28   ;;  %s5964_s28 = sphi %s6060_s28, %s7000_s28   ;;  %s5960_s27 = sphi %s6058_s27, %s7002_s27   ;;  %s5956_s26 = sphi %s6056_s26, %s7004_s26   ;;  %s5952_s25 = sphi %s6054_s25, %s7003_s25  }
  0x16   : > { %6955 = sst [smem:[#allocation22_spill]] %s5960_s27  ;;  %s4782_s30 = sadd.s32 4294967294, %s5964_s28  }
  0x17   : > { %p58_p0 = scmp.ne.s32.totalorder %s5956_s26, %s5952_s25  ;;  %p6926_p1 = scmp.eq.s32.totalorder %s6075_s29, 0 }
  0x18   : > { %p385_p3 = scmp.eq.s32.totalorder %s4782_s30, 1  ;;  %p4783_p5 = scmp.ge.s32.totalorder %s5964_s28, 1 }
  0x19   : > { %p6084_p4 = por %p6926_p1, %p58_p0  ;;  %p392_p7 = scmp.lt.s32.totalorder %s5964_s28, 3 }
  0x1a   : > { %p6089_p6 = por %p385_p3, %p58_p0  ;;  %s5966_s17 = smov [#allocation13]  }
  0x1b   : > { %s6956_s14 = scalar_select %p6084_p4, 1, 0 }
  0x1c   : > { %s6957_s15 = scalar_select %p6089_p6, 1, 0 }
  0x1d   : > { %p6094_p8 = pnand %p4783_p5, %p392_p7  ;;  %s404_s18 = sshll.u32 %s5966_s17, 4  ;;  %s6098_s18 = int_to_ptr.vmem [resolvable:$true] %s404_s18 }
  0x1e   : > { %6958 = sst [smem:[#allocation23_spill]] %s6957_s15  ;;  %s6110_s20 = sadd.s32 1, %s5964_s28  }
  0x1f   : > { %s6959_s16 = scalar_select %p6094_p8, 1, 0 }
  0x20   : > { %p5462_p9 = pneg %p6094_p8  ;;  %6961 = sst [smem:[#allocation24_spill]] %s6110_s20 }
  0x21   : > { %s45_s21 = sadd.s32 1, %s5960_s27  ;;  %s42_s22 = ssub.s32 %s5964_s28, %s6110_s20 }
  0x22   : > { %p6105_p11 = pnand %p5462_p9, %p6926_p1  ;;  %s6962_s10 = sld [smem:[#allocation32_spill]] }
  0x24   : > { %p5676_p13 = pneg %p6105_p11 }
  0x28   : > { %s5674_s30 = scalar_lea.hbm %s6962_s10, 4096 }
  0x29   : > { %p5675_p12 = scmp.ne.s32.totalorder %s6962_s10, %s5674_s30  ;;  %p5681_p5 = scmp.lt.u32.totalorder %s5674_s30, %s6962_s10 }
  0x2b   : > { %p5677_p0 = pnand %p5676_p13, %p5675_p12 }
  0x2d   : > { %p5678_p3 = pneg %p5677_p0 }
  0x2f   : > { %p5683_p7 = pnand %p5681_p5, %p5678_p3 }
  0x31   : > { %5686 = shalt.err (!%p5683_p7)
}
  0x32   : > { %s5687_s20 = scalar_lea.vmem %s6098_s18, 4096  ;;  %p5695_p2 = scmp.lt.s32.totalorder %s6098_s18, %s6098_s18 }
  0x33   : > { %p5688_p9 = scmp.ne.s32.totalorder %s6098_s18, %s5687_s20  ;;  %p5696_p6 = scmp.lt.s32.totalorder %s5687_s20, %s5687_s20 }
  0x35   : > { %p5690_p10 = pnand %p5688_p9, %p5676_p13  ;;  %p5697_p4 = por %p5696_p6, %p5695_p2 }
  0x37   : > { %p5691_p1 = pneg %p5690_p10 }
  0x39   : > { %p5698_p8 = pnand %p5697_p4, %p5691_p1 }
  0x3b   : > { %5701 = shalt.err (!%p5698_p8)
}
  0x3c   : > { %s6929_s15 = smov 128   ;;  %s6931_s13 = smov 8  }
  0x3d   : > { %5465 = dma.hbm_to_vmem [thread:$0]  (!%p6105_p11), %s6962_s10, 4096, %s6098_s18, [#allocation12], %s6929_s15, %s6929_s15, %s6931_s13  }
  0x3e   : > { %p43_p1 = scmp.eq.s32.totalorder %s42_s22, 0  ;;  %p52_p2 = scmp.ne.s32.totalorder %s5960_s27, %s5956_s26 }
  0x3f   : > { %p53_p4 = scmp.eq.s32.totalorder %s5964_s28, 0  ;;  %p5490_p6 = scmp.lt.s32.totalorder %s5964_s28, 2 }
  0x40   : > { %s6144_s23 = scalar_select %p43_p1, %s5960_s27, %s45_s21  }
  0x41   : > { %p54_p8 = por %p53_p4, %p52_p2  ;;  %p6964_p10 = scmp.eq.s32.totalorder %s6075_s29, 1 }
  0x42   : > { %6963 = sst [smem:[#allocation25_spill]] %s6144_s23  ;;  %s6153_s19 = sand.u32 1, %s5960_s27  }
  0x43   : > { %p6148_p12 = por %p6964_p10, %p52_p2  ;;  %s6156_s30 = sand.u32 1, %s5964_s28  }
  0x44   : > { %p6158_p13 = pnand %p5490_p6, %p54_p8  ;;  %s4789_s22 = sshll.u32 %s6153_s19, 2 }
  0x45   : > { %s6965_s24 = scalar_select %p6148_p12, 1, 0 }
  0x46   : > { %s6967_s18 = scalar_select %p6158_p13, 1, 0 }
  0x47   : > { %6966 = sst [smem:[#allocation26_spill]] %s6965_s24  ;;  %s4790_s21 = sshll.u32 %s5964_s28, 6 }
  0x48   : > { %s6968_s1 = sld [smem:[#allocation28_spill]]  ;;  %s449_s15 = scalar_lea.vmem [#allocation5], %s4789_s22 }
  0x49   : > { %s456_s13 = sshll.u32 %s449_s15, 4  ;;  %p6176_p0 = pneg %p6158_p13  ;;  %s6169_s13 = int_to_ptr.vmem [resolvable:$true] %s456_s13 }
  0x4e   : > { %s6167_s20 = scalar_lea.hbm %s6968_s1, %s4790_s21  ;;  %s5707_s25 = scalar_lea.hbm %s6968_s1, 128 }
  0x4f   : > { %s5702_s23 = scalar_lea.hbm %s6167_s20, 64  ;;  %p5708_p7 = scmp.lt.u32.totalorder %s6167_s20, %s6968_s1 }
  0x50   : > { %p5703_p11 = scmp.ne.s32.totalorder %s6167_s20, %s5702_s23  ;;  %p5709_p9 = scmp.lt.u32.totalorder %s5707_s25, %s5702_s23 }
  0x51   : > { %p5711_p2 = scmp.lt.u32.totalorder %s5702_s23, %s6167_s20 }
  0x52   : > { %p5705_p3 = pnand %p6176_p0, %p5703_p11  ;;  %p5710_p1 = por %p5709_p9, %p5708_p7 }
  0x54   : > { %p5706_p5 = pneg %p5705_p3  ;;  %p5712_p4 = por %p5711_p2, %p5710_p1 }
  0x56   : > { %p5713_p6 = pnand %p5712_p4, %p5706_p5 }
  0x58   : > { %5716 = shalt.err (!%p5713_p6)
}
  0x59   : > { %s5717_s10 = scalar_lea.vmem %s6169_s13, 64  ;;  %s5969_s21 = smov [#allocation5]  }
  0x5a   : > { %p5718_p8 = scmp.ne.s32.totalorder %s6169_s13, %s5717_s10  ;;  %s5722_s17 = sshll.u32 %s5969_s21, 4  ;;  %s5723_s17 = int_to_ptr.vmem [resolvable:$false] %s5722_s17 }
  0x5b   : > { %s5724_s22 = scalar_lea.vmem %s5723_s17, 128  ;;  %p5725_p3 = scmp.lt.s32.totalorder %s6169_s13, %s5723_s17 }
  0x5c   : > { %p5720_p10 = pnand %p5718_p8, %p6176_p0  ;;  %p5726_p12 = scmp.lt.s32.totalorder %s5724_s22, %s5717_s10 }
  0x5e   : > { %p5721_p11 = pneg %p5720_p10  ;;  %p5727_p7 = por %p5726_p12, %p5725_p3 }
  0x60   : > { %p5728_p9 = pnand %p5727_p7, %p5721_p11 }
  0x62   : > { %5731 = shalt.err (!%p5728_p9)
}
  0x63   : > { %s6970_s23 = scalar_lea.sflag [#allocation6], %s6156_s30  ;;  %s6937_s25 = sshll.u32 %s6153_s19, 3 }
  0x64   : > { %5472 = dma.hbm_to_vmem [thread:$0]  (!%p6158_p13), %s6167_s20, 64, %s6169_s13, %s6970_s23  }
  0x65   : > { %s6938_s15 = sshll.u32 %s5964_s28, 7  ;;  %s6971_s3 = sld [smem:[#allocation29_spill]] }
  0x66   : > { %s485_s22 = scalar_lea.vmem [#allocation8], %s6937_s25  ;;  %s6941_s24 = scalar_lea.sflag [#allocation9], %s6156_s30 }
  0x67   : > { %s492_s1 = sshll.u32 %s485_s22, 4  ;;  %s493_s1 = int_to_ptr.vmem [resolvable:$true] %s492_s1 }
  0x6b   : > { %s6208_s17 = scalar_lea.hbm %s6971_s3, %s6938_s15  ;;  %s5737_s23 = scalar_lea.hbm %s6971_s3, 256 }
  0x6c   : > { %s5732_s12 = scalar_lea.hbm %s6208_s17, 128  ;;  %p5738_p2 = scmp.lt.u32.totalorder %s6208_s17, %s6971_s3 }
  0x6d   : > { %p5733_p12 = scmp.ne.s32.totalorder %s6208_s17, %s5732_s12  ;;  %p5739_p4 = scmp.lt.u32.totalorder %s5737_s23, %s5732_s12 }
  0x6e   : > { %p5741_p8 = scmp.lt.u32.totalorder %s5732_s12, %s6208_s17 }
  0x6f   : > { %p5735_p5 = pnand %p5733_p12, %p6176_p0  ;;  %p5740_p6 = por %p5739_p4, %p5738_p2 }
  0x71   : > { %p5736_p1 = pneg %p5735_p5  ;;  %p5742_p10 = por %p5741_p8, %p5740_p6 }
  0x73   : > { %p5743_p11 = pnand %p5742_p10, %p5736_p1 }
  0x75   : > { %5746 = shalt.err (!%p5743_p11)
}
  0x76   : > { %s5747_s22 = scalar_lea.vmem %s493_s1, 128  ;;  %s5970_s25 = smov [#allocation8]  }
  0x77   : > { %p5748_p3 = scmp.ne.s32.totalorder %s493_s1, %s5747_s22  ;;  %s5752_s15 = sshll.u32 %s5970_s25, 4  ;;  %s5753_s15 = int_to_ptr.vmem [resolvable:$false] %s5752_s15 }
  0x78   : > { %s5754_s13 = scalar_lea.vmem %s5753_s15, 256  ;;  %p5755_p12 = scmp.lt.s32.totalorder %s493_s1, %s5753_s15 }
  0x79   : > { %p5750_p7 = pnand %p5748_p3, %p6176_p0  ;;  %p5756_p5 = scmp.lt.s32.totalorder %s5754_s13, %s5747_s22 }
  0x7b   : > { %p5751_p9 = pneg %p5750_p7  ;;  %p5757_p13 = por %p5756_p5, %p5755_p12 }
  0x7d   : > { %p5758_p2 = pnand %p5757_p13, %p5751_p9 }
  0x7f   : > { %5761 = shalt.err (!%p5758_p2)
}
  0x80   : > { %p6972_p4 = scmp.ne.s32.totalorder %s6967_s18, 0  ;;  %s6943_s12 = sshll.u32 %s6153_s19, 5 }
  0x81   : > { %s6942_s25 = sshll.u32 %s5964_s28, 9  ;;  %s6973_s0 = sld [smem:[#allocation27_spill]] }
  0x82   : > { %5478 = dma.hbm_to_vmem [thread:$0]  (!%p6972_p4), %s6208_s17, 128, %s493_s1, %s6941_s24  }
  0x83   : > { %s6974_s10 = sshll.u32 %s5964_s28, 7  ;;  %s428_s1 = scalar_lea.vmem [#allocation2], %s6943_s12 }
  0x84   : > { %s6246_s13 = scalar_lea.hbm %s6909_s2, %s6974_s10  ;;  %s435_s17 = sshll.u32 %s428_s1, 4  ;;  %s6250_s17 = int_to_ptr.vmem [resolvable:$true] %s435_s17 }
  0x85   : > { %s425_s24 = scalar_lea.sflag [#allocation3], %s6153_s19 }
  0x87   : > { %s6239_s23 = scalar_lea.hbm %s6973_s0, %s6942_s25  ;;  %s5767_s21 = scalar_lea.hbm %s6973_s0, 1024 }
  0x88   : > { %s5762_s3 = scalar_lea.hbm %s6239_s23, 512  ;;  %p5768_p8 = scmp.lt.u32.totalorder %s6239_s23, %s6973_s0 }
  0x89   : > { %p5763_p13 = scmp.ne.s32.totalorder %s6239_s23, %s5762_s3  ;;  %p5769_p10 = scmp.lt.u32.totalorder %s5767_s21, %s5762_s3 }
  0x8a   : > { %p5771_p3 = scmp.lt.u32.totalorder %s5762_s3, %s6239_s23 }
  0x8b   : > { %p5765_p1 = pnand %p5763_p13, %p6176_p0  ;;  %p5770_p11 = por %p5769_p10, %p5768_p8 }
  0x8d   : > { %p5766_p6 = pneg %p5765_p1  ;;  %p5772_p7 = por %p5771_p3, %p5770_p11 }
  0x8f   : > { %p5773_p9 = pnand %p5772_p7, %p5766_p6 }
  0x91   : > { %5776 = shalt.err (!%p5773_p9)
}
  0x92   : > { %s5777_s10 = scalar_lea.vmem %s6250_s17, 512  ;;  %s5971_s1 = smov [#allocation2]  }
  0x93   : > { %p5778_p12 = scmp.ne.s32.totalorder %s6250_s17, %s5777_s10  ;;  %s5782_s15 = sshll.u32 %s5971_s1, 4  ;;  %s5783_s15 = int_to_ptr.vmem [resolvable:$false] %s5782_s15 }
  0x94   : > { %s5784_s25 = scalar_lea.vmem %s5783_s15, 1024  ;;  %p5785_p13 = scmp.lt.s32.totalorder %s6250_s17, %s5783_s15 }
  0x95   : > { %p5780_p5 = pnand %p5778_p12, %p6176_p0  ;;  %p5786_p1 = scmp.lt.s32.totalorder %s5784_s25, %s5777_s10 }
  0x97   : > { %p5781_p2 = pneg %p5780_p5  ;;  %p5787_p8 = por %p5786_p1, %p5785_p13 }
  0x99   : > { %p5788_p10 = pnand %p5787_p8, %p5781_p2 }
  0x9b   : > { %5791 = shalt.err (!%p5788_p10)
}
  0x9c   : > { %s6975_s3 = smov 8   ;;  %s6976_s20 = smov 128  }
  0x9d   : > { %5469 = dma.hbm_to_vmem [thread:$0]  (!%p6972_p4), %s6239_s23, 512, %s6250_s17, %s425_s24, %s6976_s20, %s6976_s20, %s6975_s3  }
  0x9e   : > { %s6977_s21 = sshll.u32 %s5964_s28, 9  ;;  %s6978_s15 = sshll.u32 %s6153_s19, 3 }
  0x9f   : > { %s6284_s1 = scalar_lea.hbm %s6912_s5, %s6977_s21  ;;  %s467_s25 = scalar_lea.vmem [#allocation7], %s6978_s15 }
  0xa0   : > { %s474_s12 = sshll.u32 %s467_s25, 4  ;;  %s6979_s0 = sshll.u32 %s6153_s19, 5  ;;  %s475_s12 = int_to_ptr.vmem [resolvable:$true] %s474_s12 }
  0xa1   : > { %s6290_s11 = scalar_lea.vmem [#allocation11], %s6979_s0  ;;  %s5792_s8 = scalar_lea.hbm %s6246_s13, 128 }
  0xa2   : > { %s531_s9 = sshll.u32 %s6290_s11, 4  ;;  %p5793_p6 = scmp.ne.s32.totalorder %s6246_s13, %s5792_s8  ;;  %s6321_s9 = int_to_ptr.vmem [resolvable:$true] %s531_s9 }
  0xa3   : > { %s5797_s17 = scalar_lea.hbm %s6909_s2, 256  ;;  %p5798_p7 = scmp.lt.u32.totalorder %s6246_s13, %s6909_s2 }
  0xa4   : > { %p5795_p11 = pnand %p5793_p6, %p6176_p0  ;;  %p5799_p9 = scmp.lt.u32.totalorder %s5797_s17, %s5792_s8 }
  0xa5   : > { %p5801_p5 = scmp.lt.u32.totalorder %s5792_s8, %s6246_s13 }
  0xa6   : > { %p5796_p3 = pneg %p5795_p11  ;;  %p5800_p12 = por %p5799_p9, %p5798_p7 }
  0xa8   : > { %p5802_p2 = por %p5801_p5, %p5800_p12 }
  0xaa   : > { %p5803_p13 = pnand %p5802_p2, %p5796_p3 }
  0xac   : > { %5806 = shalt.err (!%p5803_p13)
}
  0xad   : > { %s5807_s0 = scalar_lea.vmem %s475_s12, 128  ;;  %s5972_s10 = smov [#allocation7]  }
  0xae   : > { %p5808_p1 = scmp.ne.s32.totalorder %s475_s12, %s5807_s0  ;;  %s5812_s15 = sshll.u32 %s5972_s10, 4  ;;  %s5813_s15 = int_to_ptr.vmem [resolvable:$false] %s5812_s15 }
  0xaf   : > { %s5814_s25 = scalar_lea.vmem %s5813_s15, 256  ;;  %p5815_p6 = scmp.lt.s32.totalorder %s475_s12, %s5813_s15 }
  0xb0   : > { %p5810_p8 = pnand %p5808_p1, %p6176_p0  ;;  %p5816_p11 = scmp.lt.s32.totalorder %s5814_s25, %s5807_s0 }
  0xb2   : > { %p5811_p10 = pneg %p5810_p8  ;;  %p5817_p4 = por %p5816_p11, %p5815_p6 }
  0xb4   : > { %p5818_p7 = pnand %p5817_p4, %p5811_p10 }
  0xb6   : > { %5821 = shalt.err (!%p5818_p7)
}
  0xb7   : > { %p6980_p9 = scmp.ne.s32.totalorder %s6967_s18, 0  ;;  %s6981_s8 = scalar_lea.sflag [#allocation6], %s6156_s30 }
  0xb8   : > { %s4795_s24 = sshll.u32 %s6153_s19, 4  ;;  %s4889_s23 = sshll.u32 %s5964_s28, 8 }
  0xb9   : > { %5475 = dma.hbm_to_vmem [thread:$0]  (!%p6980_p9), %s6246_s13, 128, %s475_s12, %s6981_s8  }
  0xba   : > { %s6317_s22 = scalar_lea.hbm %s6911_s4, %s4889_s23  ;;  %s503_s0 = scalar_lea.vmem [#allocation10], %s4795_s24 }
  0xbb   : > { %s510_s10 = sshll.u32 %s503_s0, 4  ;;  %s5822_s15 = scalar_lea.hbm %s6317_s22, 256  ;;  %s6323_s10 = int_to_ptr.vmem [resolvable:$true] %s510_s10 }
  0xbc   : > { %p5823_p4 = scmp.ne.s32.totalorder %s6317_s22, %s5822_s15  ;;  %s5827_s13 = scalar_lea.hbm %s6911_s4, 512 }
  0xbd   : > { %p5828_p5 = scmp.lt.u32.totalorder %s6317_s22, %s6911_s4  ;;  %p5829_p2 = scmp.lt.u32.totalorder %s5827_s13, %s5822_s15 }
  0xbe   : > { %p5825_p3 = pnand %p5823_p4, %p6176_p0  ;;  %p5831_p1 = scmp.lt.u32.totalorder %s5822_s15, %s6317_s22 }
  0xbf   : > { %p5830_p13 = por %p5829_p2, %p5828_p5 }
  0xc0   : > { %p5826_p12 = pneg %p5825_p3 }
  0xc1   : > { %p5832_p8 = por %p5831_p1, %p5830_p13 }
  0xc3   : > { %p5833_p10 = pnand %p5832_p8, %p5826_p12 }
  0xc5   : > { %5836 = shalt.err (!%p5833_p10)
}
  0xc6   : > { %s5837_s8 = scalar_lea.vmem %s6323_s10, 256  ;;  %s5973_s24 = smov [#allocation10]  }
  0xc7   : > { %p5838_p6 = scmp.ne.s32.totalorder %s6323_s10, %s5837_s8  ;;  %s5842_s23 = sshll.u32 %s5973_s24, 4  ;;  %s5843_s23 = int_to_ptr.vmem [resolvable:$false] %s5842_s23 }
  0xc8   : > { %s5844_s17 = scalar_lea.vmem %s5843_s23, 512  ;;  %p5845_p4 = scmp.lt.s32.totalorder %s6323_s10, %s5843_s23 }
  0xc9   : > { %p5840_p11 = pnand %p5838_p6, %p6176_p0  ;;  %p5846_p3 = scmp.lt.s32.totalorder %s5844_s17, %s5837_s8 }
  0xcb   : > { %p5841_p7 = pneg %p5840_p11  ;;  %p5847_p5 = por %p5846_p3, %p5845_p4 }
  0xcd   : > { %p5848_p2 = pnand %p5847_p5, %p5841_p7 }
  0xcf   : > { %5851 = shalt.err (!%p5848_p2)
}
  0xd0   : > { %s6982_s21 = scalar_lea.sflag [#allocation9], %s6156_s30  ;;  %s521_s0 = scalar_lea.sflag [#allocation12], %s6156_s30 }
  0xd1   : > { %5481 = dma.hbm_to_vmem [thread:$0]  (!%p6980_p9), %s6317_s22, 256, %s6323_s10, %s6982_s21, %s6976_s20, %s6976_s20, %s6975_s3  }
  0xd2   : > { %s5852_s15 = scalar_lea.hbm %s6284_s1, 512  ;;  %s5857_s13 = scalar_lea.hbm %s6912_s5, 1024 }
  0xd3   : > { %p5853_p12 = scmp.ne.s32.totalorder %s6284_s1, %s5852_s15  ;;  %p5858_p8 = scmp.lt.u32.totalorder %s6284_s1, %s6912_s5 }
  0xd4   : > { %p5859_p10 = scmp.lt.u32.totalorder %s5857_s13, %s5852_s15  ;;  %p5861_p11 = scmp.lt.u32.totalorder %s5852_s15, %s6284_s1 }
  0xd5   : > { %p5855_p13 = pnand %p5853_p12, %p6176_p0 }
  0xd6   : > { %p5860_p6 = por %p5859_p10, %p5858_p8 }
  0xd7   : > { %p5856_p1 = pneg %p5855_p13 }
  0xd8   : > { %p5862_p7 = por %p5861_p11, %p5860_p6 }
  0xda   : > { %p5863_p4 = pnand %p5862_p7, %p5856_p1 }
  0xdc   : > { %5866 = shalt.err (!%p5863_p4)
}
  0xdd   : > { %s5867_s22 = scalar_lea.vmem %s6321_s9, 512  ;;  %s5974_s10 = smov [#allocation11]  }
  0xde   : > { %p5868_p3 = scmp.ne.s32.totalorder %s6321_s9, %s5867_s22  ;;  %s5872_s8 = sshll.u32 %s5974_s10, 4  ;;  %s5873_s8 = int_to_ptr.vmem [resolvable:$false] %s5872_s8 }
  0xdf   : > { %s5874_s24 = scalar_lea.vmem %s5873_s8, 1024  ;;  %p5875_p12 = scmp.lt.s32.totalorder %s6321_s9, %s5873_s8 }
  0xe0   : > { %p5870_p5 = pnand %p5868_p3, %p6176_p0  ;;  %p5876_p13 = scmp.lt.s32.totalorder %s5874_s24, %s5867_s22 }
  0xe2   : > { %p5871_p2 = pneg %p5870_p5  ;;  %p5877_p8 = por %p5876_p13, %p5875_p12 }
  0xe4   : > { %p5878_p10 = pnand %p5877_p8, %p5871_p2 }
  0xe6   : > { %5881 = shalt.err (!%p5878_p10)
}
  0xe7   : > { %5484 = dma.hbm_to_vmem [thread:$0]  (!%p6980_p9), %s6284_s1, 512, %s6321_s9, %s521_s0, %s6976_s20, %s6976_s20, %s6975_s3  }
  0xe8   : > { %p6983_p0 = scmp.ne.s32.totalorder %s6959_s16, 0 }
  0xe9   : > { %s6381_s27 = sand.u32 (!%p6983_p0), 1, %s5956_s26   ;;  %p6984_p1 = scmp.ne.s32.totalorder (!%p6983_p0), %s6956_s14, 0 }
  0xea   : > { %571 = sbr.rel (%p6983_p0) target bundleno = 8572 (0x217c), region = 72  ;;  %s6384_s23 = sshll.u32 (!%p6983_p0), %s6381_s27, 5 }
  0xeb   : > { %s574_s18 = scalar_lea.sflag (!%p6983_p0), [#allocation3], %s6381_s27  ;;  %s6388_s17 = scalar_lea.vmem (!%p6983_p0), [#allocation2], %s6384_s23 }
  0xf1   : > { %5927 = dma.done.wait (%p6984_p1), %s574_s18, 512  }
  0xf2   : > { %5929 = vsyncadd (%p6984_p1), %s574_s18, 4294966784  ;;  %s582_s9 = sand.u32 1, %s6075_s29   ;;  %s4803_s16 = sshll.u32 %s6381_s27, 2 }
  0xf3   : > { %s583_s30 = scalar_lea.sflag [#allocation6], %s582_s9  ;;  %s586_s3 = scalar_lea.vmem [#allocation5], %s4803_s16 }
  0xf4   : > { %5931 = dma.done.wait (%p6984_p1), %s583_s30, 192  }
  0xf5   : > { %5933 = vsyncadd (%p6984_p1), %s583_s30, 4294967104  ;;  %s4804_s20 = sshll.u32 %s6381_s27, 3  ;;  %s601_s21 = scalar_lea.sflag [#allocation9], %s582_s9 }
  0xf6   : > { %s6401_s1 = scalar_lea.vmem [#allocation7], %s4804_s20  ;;  %s6403_s0 = scalar_lea.vmem [#allocation8], %s4804_s20 }
  0xf7   : > { %5935 = dma.done.wait (%p6984_p1), %s601_s21, 384  }
  0xf8   : > { %5937 = vsyncadd (%p6984_p1), %s601_s21, 4294966912  ;;  %s4806_s15 = sshll.u32 %s6381_s27, 4  ;;  %s619_s12 = scalar_lea.sflag [#allocation12], %s582_s9 }
  0xf9   : > { %s6410_s19 = scalar_lea.vmem [#allocation10], %s4806_s15  ;;  %s6413_s13 = scalar_lea.vmem [#allocation11], %s6384_s23 }
  0xfa   : > { %5939 = dma.done.wait (%p6984_p1), %s619_s12, 512  }
  0xfb   : > { %5941 = vsyncadd (%p6984_p1), %s619_s12, 4294966784  ;;  %p6985_p9 = scmp.eq.s32.totalorder %s6075_s29, 0 }
  0xfd   : > { %5943 = dma.done.wait (%p6985_p9), [#allocation12], 4096   ;;  %p6986_p6 = pmov %p6985_p9 }
  0xfe   : > { %v743_v0 = vlaneseq  ;;  %v5975_v1 = vmov 1966171168   ;;  %v784_v6 = vld [vmem:[#allocation13] sm:$0xff]  ;;  %v785_v7 = vld [vmem:[#allocation13 + $0x8] sm:$0xff]  ;;  %v786_v8 = vld [vmem:[#allocation13 + $0x10] sm:$0xff]  ;;  %vm788_vm0 = vcmask 261120  }
  0xff   : > { %5945 = vsyncadd (%p6986_p6), [#allocation12], 4294963200  ;;  %v741_v2 = vunpack.c.l.s4 %v5975_v1  ;;  %v5338_v10 = vpack.c.bf16 %v785_v7, %v784_v6  ;;  %v787_v11 = vld [vmem:[#allocation13 + $0x18] sm:$0xff]  ;;  %v727_v20 = vld [vmem:[%s6388_s17 + $0x8] sm:$0xff]  ;;  %v5976_v31 = vmov 0.0   ;;  %vm5977_vm1 = vmmov 0  }
 0x100   : > { %v6423_v3 = vshrl.u32 %v743_v0, 7  ;;  %v4814_v12 = vld.sshfl [vmem:[%s586_s3] sm:$0x33 pattern:$0x75316420]  ;;  %v5342_v13 = vpack.c.bf16 %v787_v11, %v786_v8  ;;  %v728_v21 = vld [vmem:[%s6388_s17 + $0x10] sm:$0xff]  ;;  %5044 = vmatprep.subr.mxu1 %v5976_v31  ;;  %5046 = vmatprep.mubr.msk.f32.mxu1 %vm5977_vm1, %v5976_v31  ;;  %vm6785_vm7 = vmpackc.low %vm788_vm0, %vm788_vm0 }
 0x101   : > { %v742_v4 = vunpack.c.0.s8 %v741_v2  ;;  %v739_v14 = vcombine.high %v4814_v12, %v4814_v12  ;;  %5339 = vmatprep.subr.bf16.mxu0 %v5338_v10  ;;  %v726_v16 = vld [vmem:[%s6388_s17] sm:$0xff]  ;;  %v729_v28 = vld [vmem:[%s6388_s17 + $0x18] sm:$0xff]  ;;  %s5978_s14 = smov 96   ;;  %v6488_v41 = vld [vmem:[%s6413_s13] sm:$0xff]  ;;  %vm1202_vm2 = vcmask 64512   ;;  %s5979_s11 = smov 64  }
 0x102   : > { %v6429_v9 = vsub.s32 0, %v6423_v3  ;;  %5341 = vmatpush3.bf16.msra.mxu0 %v5338_v10  ;;  %v6492_v46 = vld [vmem:[%s6413_s13 + $0x8] sm:$0xff]  ;;  %v6497_v53 = vld [vmem:[%s6413_s13 + $0x10] sm:$0xff]  ;;  %v6501_v59 = vld [vmem:[%s6413_s13 + $0x18] sm:$0xff]  ;;  %p710_p11 = scmp.lt.s32.totalorder %s6075_s29, 1  ;;  %vm2385_vm3 = vcmask 1041409  }
 0x103   : > { %v6426_v5 = vsub.s32 %v742_v4, %v6423_v3  ;;  %5343 = vmatprep.subr.bf16.mxu0 %v5342_v13  ;;  %vm2387_vm4 = vcmask 1042434   ;;  %vm2389_vm5 = vcmask 1043459   ;;  %vm2630_vm6 = vcmask 60416   ;;  %s6987_s20 = sld [smem:[#allocation30_spill]]  ;;  %s6990_s15 = sld [smem:[#allocation31_spill]] }
 0x104   : > { %s711_s25 = scalar_select %p710_p11, %s6075_s29, 1  ;;  %vm3969_vm8 = vcmask 125952   ;;  %vm3987_vm9 = vcmask 130048  }
 0x105   : > { %v746_v15 = vrot.slane %v4814_v12, %v6426_v5  ;;  %v753_v17 = vrot.slane %v739_v14, %v6426_v5  ;;  %s6991_s13 = sld [smem:[#allocation33_spill]]  ;;  %s4891_s8 = sshll.u32 %s6075_s29, 9 }
 0x106   : > { %5345 = vmatpush3.bf16.msra.mxu0 %v5342_v13  ;;  %s6609_s22 = sshll.u32 %s711_s25, 2  ;;  %s6992_s25 = sld [smem:[#allocation34_spill]] }
 0x107   : > { %v754_v18 = vcombine.high %v746_v15, %v746_v15  ;;  %v759_v19 = vrot.slane %v746_v15, %v6429_v9  ;;  %v763_v23 = vrot.slane %v753_v17, %v6429_v9  ;;  %v755_v25 = vcombine.high %v753_v17, %v753_v17  ;;  %5059 = vmatprep.subr.mxu0 %v5976_v31  ;;  %s713_s24 = scalar_lea.vmem %s6913_s6, %s6609_s22  ;;  %s717_s16 = scalar_lea.vmem %s6914_s7, %s6609_s22 }
 0x108   : > { %s6993_s10 = sld [smem:[#allocation26_spill]]  ;;  %s6994_s9 = sld [smem:[#allocation35_spill]] }
 0x109   : > { %v776_v22 = vadd.f32 %v759_v19, %v726_v16  ;;  %v767_v24 = vrot.slane %v754_v18, %v6429_v9  ;;  %v777_v26 = vadd.f32 %v763_v23, %v727_v20  ;;  %v771_v29 = vrot.slane %v755_v25, %v6429_v9  ;;  %s4530_s30 = scalar_lea.sflag [#allocation4], %s6381_s27  ;;  %s5981_s29 = smov [#allocation14]  }
 0x10b   : > { %5038 = vmatprep.mubr.msk.f32.mxu0 %vm788_vm0, %v776_v22  ;;  %v778_v27 = vadd.f32 %v767_v24, %v728_v21  ;;  %v779_v30 = vadd.f32 %v771_v29, %v729_v28 }
 0x10c   : > { %5039 = vmatmul.mubr.msk.f32.vlgmr.msra.gmra.mrb[0].mxu0 %vm788_vm0, %v777_v26 }
 0x10d   : > { %5041 = vmatprep.mubr.msk.f32.mxu0 %vm788_vm0, %v778_v27 }
 0x10e   : > { %p6995_p4 = scmp.ne.s32.totalorder %s6993_s10, 0 }
 0x110   : > { %5042 = vmatmul.mubr.msk.f32.gmra.mrb[2].mxu0 %vm788_vm0, %v779_v30 }
 0x111   : > { %5061 = vmatprep.mubr.msk.f32.mxu0 %vm5977_vm1, %v5976_v31 }
 0x1df   : > { %v6451_v32 = vpop.f32.mrb[0].mxu0 }
 0x1e0   : > { %v867_v33 = vpop.f32.mrb[1].mxu0 }
 0x1e1   : > { %887 = vrot.lane.b32.xlu0 %v867_v33, %s5978_s14 }
 0x1e3   : > { %v6454_v34 = vpop.f32.mrb[2].mxu0 }
 0x1e4   : > { %v6456_v35 = vpop.f32.mrb[3].mxu0 }
 0x1e5   : > { %964 = vrot.lane.b32.xlu0 %v6451_v32, %s5978_s14  ;;  %1041 = vrot.lane.b32.xlu1 %v6456_v35, %s5978_s14 }
 0x1e9   : > { %1118 = vrot.lane.b32.xlu1 %v6454_v34, %s5978_s14 }
 0x253   : > { %v888_v36 = vpop.permute.xlu0 %887 }
 0x254   : > { %5045 = vmatpush3.xpose.msk.msra.mxu1 %vm788_vm0, %v888_v36 }
 0x255   : > { %5049 = vmatprep.subr.mxu1 %v5976_v31 }
 0x257   : > { %5047 = vmatmul.mubr.msk.f32.vlgmr.msra.gmra.mrb[0].mxu1 %vm788_vm0, %v867_v33  ;;  %v965_v37 = vpop.permute.xlu0 %964  ;;  %v1042_v38 = vpop.permute.xlu1 %1041 }
 0x258   : > { %5050 = vmatpush3.xpose.msk.msra.mxu1 %vm788_vm0, %v965_v37  ;;  %5051 = vmatprep.mubr.msk.f32.mxu1 %vm5977_vm1, %v5976_v31 }
 0x259   : > { %5054 = vmatprep.subr.mxu1 %v5976_v31 }
 0x25b   : > { %5052 = vmatmul.mubr.msk.f32.vlgmr.msra.gmra.mrb[2].mxu1 %vm788_vm0, %v6451_v32  ;;  %v1119_v39 = vpop.permute.xlu1 %1118 }
 0x25c   : > { %5055 = vmatpush3.xpose.msk.msra.mxu1 %vm788_vm0, %v1042_v38  ;;  %5060 = vmatpush3.xpose.msk.msra.mxu0 %vm788_vm0, %v1119_v39 }
 0x25d   : > { %5056 = vmatprep.mubr.msk.f32.mxu1 %vm5977_vm1, %v5976_v31  ;;  %5064 = vmatprep.subr.mxu1 %v5976_v31 }
 0x25e   : > { %5069 = vmatprep.subr.mxu0 %v5976_v31 }
 0x25f   : > { %5057 = vmatmul.mubr.msk.f32.vlgmr.msra.gmra.mrb[4].mxu1 %vm788_vm0, %v6456_v35  ;;  %5062 = vmatmul.mubr.msk.f32.vlgmr.msra.gmra.mrb[4].mxu0 %vm788_vm0, %v6454_v34 }
 0x260   : > { %5066 = vmatprep.mubr.msk.f32.mxu1 %vm5977_vm1, %v5976_v31  ;;  %5071 = vmatprep.mubr.msk.f32.mxu0 %vm5977_vm1, %v5976_v31 }
 0x32a   : > { %v959_v40 = vpop.f32.mrb[0].mxu1 }
 0x32b   : > { %v1194_v42 = vmul.f32 0.17677669, %v959_v40  ;;  %v5048_v43 = vpop.f32.mrb[1].mxu1  ;;  %v1552_v40 = vld [vmem:[#allocation13 + $0x20] sm:$0xff] }
 0x32c   : > { %v1554_v43 = vld [vmem:[#allocation13 + $0x30] sm:$0xff] }
 0x32d   : > { %v1198_v44 = vadd.f32 %v1194_v42, %v6488_v41  ;;  %v1553_v42 = vld [vmem:[#allocation13 + $0x28] sm:$0xff] }
 0x32e   : > { %v1036_v45 = vpop.f32.mrb[2].mxu1 }
 0x32f   : > { %v1195_v47 = vmul.f32 0.17677669, %v1036_v45  ;;  %v5053_v48 = vpop.f32.mrb[3].mxu1  ;;  %v1203_v49 = vsel %vm1202_vm2, %v1198_v44, -inf  ;;  %v1555_v45 = vld [vmem:[#allocation13 + $0x38] sm:$0xff] }
 0x330   : > { %1204 = vmax.xlane.f32.xlu0 %v1203_v49 }
 0x331   : > { %v1199_v50 = vadd.f32 %v1195_v47, %v6492_v46  ;;  %v5350_v47 = vpack.c.bf16 %v1555_v45, %v1554_v43  ;;  %v6597_v45 = vld [vmem:[#allocation13 + $0x48] sm:$0xff] }
 0x332   : > { %v1113_v51 = vpop.f32.mrb[4].mxu1  ;;  %v1190_v52 = vpop.f32.mrb[4].mxu0 }
 0x333   : > { %v1196_v54 = vmul.f32 0.17677669, %v1113_v51  ;;  %v1197_v55 = vmul.f32 0.17677669, %v1190_v52  ;;  %v5058_v56 = vpop.f32.mrb[5].mxu1  ;;  %v5063_v57 = vpop.f32.mrb[5].mxu0 }
 0x334   : > { %v1206_v58 = vsel %vm1202_vm2, %v1199_v50, -inf }
 0x335   : > { %1207 = vmax.xlane.f32.xlu1 %v1206_v58  ;;  %v1200_v60 = vadd.f32 %v1196_v54, %v6497_v53  ;;  %v1201_v62 = vadd.f32 %v1197_v55, %v6501_v59 }
 0x337   : > { %v1209_v61 = vsel %vm1202_vm2, %v1200_v60, -inf  ;;  %v1212_v63 = vsel %vm1202_vm2, %v1201_v62, -inf }
 0x338   : > { %1210 = vmax.xlane.f32.xlu0 %v1209_v61 }
 0x33c   : > { %1213 = vmax.xlane.f32.xlu0 %v1212_v63 }
 0x346   : > { %1247 = vrot.lane.b32.xlu1 %v867_v33, %s5979_s11 }
 0x3bd   : > { %v1205_v0 = vpop.xlane.xlu0 %1204 }
 0x3be   : > { %v1215_v1 = vsub.f32 %v1198_v44, %v1205_v0  ;;  %v5346_v44 = vpack.c.bf16 %v1553_v42, %v1552_v40 }
 0x3c0   : > { %v1219_v2 = vmul.f32 1.442695, %v1215_v1 }
 0x3c2   : > { %5606 = vpow2.f32 %v1219_v2  ;;  %v1208_v4 = vpop.xlane.xlu1 %1207 }
 0x3c3   : > { %v1216_v8 = vsub.f32 %v1199_v50, %v1208_v4 }
 0x3c5   : > { %v1211_v6 = vpop.xlane.xlu0 %1210  ;;  %v1221_v13 = vmul.f32 1.442695, %v1216_v8 }
 0x3c6   : > { %v1248_v7 = vpop.permute.xlu1 %1247  ;;  %v1217_v20 = vsub.f32 %v1200_v60, %v1211_v6 }
 0x3c7   : > { %5065 = vmatpush3.msra.mxu1 %v1248_v7 }
 0x3c8   : > { %5074 = vmatprep.subr.mxu1 %v5976_v31  ;;  %v1223_v21 = vmul.f32 1.442695, %v1217_v20 }
 0x3c9   : > { %v1214_v10 = vpop.xlane.xlu0 %1213 }
 0x3ca   : > { %v1218_v11 = vsub.f32 %v1201_v62, %v1214_v10 }
 0x3cc   : > { %v5607_v12 = vpop.eup %5606  ;;  %v1225_v14 = vmul.f32 1.442695, %v1218_v11 }
 0x3cd   : > { %v1227_v15 = vsel %vm1202_vm2, %v5607_v12, 0.0 }
 0x3ce   : > { %5608 = vpow2.f32 %v1225_v14  ;;  %1228 = vadd.xlane.f32.xlu1 %v1227_v15 }
 0x3cf   : > { %5610 = vpow2.f32 %v1221_v13 }
 0x3d0   : > { %5612 = vpow2.f32 %v1223_v21 }
 0x3d8   : > { %v5609_v16 = vpop.eup %5608 }
 0x3d9   : > { %v1236_v17 = vsel %vm1202_vm2, %v5609_v16, 0.0  ;;  %v5611_v18 = vpop.eup %5610 }
 0x3da   : > { %1237 = vadd.xlane.f32.xlu0 %v1236_v17  ;;  %v1230_v19 = vsel %vm1202_vm2, %v5611_v18, 0.0  ;;  %v5613_v22 = vpop.eup %5612 }
 0x3db   : > { %v1233_v23 = vsel %vm1202_vm2, %v5613_v22, 0.0 }
 0x3de   : > { %1231 = vadd.xlane.f32.xlu0 %v1230_v19 }
 0x3df   : > { %1399 = vrot.lane.b32.xlu1 %v6456_v35, %s5979_s11 }
 0x3f4   : > { %1323 = vrot.lane.b32.xlu0 %v6451_v32, %s5979_s11 }
 0x403   : > { %1234 = vadd.xlane.f32.xlu1 %v1233_v23 }
 0x414   : > { %1475 = vrot.lane.b32.xlu1 %v6454_v34, %s5979_s11 }
 0x45b   : > { %v1229_v24 = vpop.xlane.xlu1 %1228 }
 0x45c   : > { %5614 = vrcp.f32 %v1229_v24 }
 0x45f   : > { %v1400_v28 = vpop.permute.xlu1 %1399 }
 0x466   : > { %v5615_v25 = vpop.eup %5614 }
 0x467   : > { %v1243_v26 = vmul.f32 %v5615_v25, %v5607_v12  ;;  %v1238_v27 = vpop.xlane.xlu0 %1237 }
 0x469   : > { %5067 = vmatmul.mubr.msk.f32.vlgmr.msra.gmra.mrb[6].mxu1 %vm1202_vm2, %v1243_v26 }
 0x46a   : > { %5075 = vmatpush3.msra.mxu1 %v1400_v28  ;;  %5076 = vmatprep.mubr.msk.f32.mxu1 %vm5977_vm1, %v5976_v31 }
 0x46b   : > { %v1232_v29 = vpop.xlane.xlu0 %1231  ;;  %5347 = vmatprep.subr.bf16.mxu1 %v5346_v44 }
 0x46c   : > { %5616 = vrcp.f32 %v1232_v29 }
 0x46d   : > { %5618 = vrcp.f32 %v1238_v27 }
 0x46f   : > { %v1324_v30 = vpop.permute.xlu0 %1323 }
 0x470   : > { %5070 = vmatpush3.msra.mxu0 %v1324_v30 }
 0x471   : > { %5079 = vmatprep.subr.mxu0 %v5976_v31 }
 0x476   : > { %v5617_v32 = vpop.eup %5616 }
 0x477   : > { %v1244_v33 = vmul.f32 %v5617_v32, %v5611_v18  ;;  %v5619_v35 = vpop.eup %5618 }
 0x478   : > { %v1246_v36 = vmul.f32 %v5619_v35, %v5609_v16 }
 0x479   : > { %5072 = vmatmul.mubr.msk.f32.vlgmr.msra.gmra.mrb[6].mxu0 %vm1202_vm2, %v1244_v33 }
 0x47a   : > { %5081 = vmatprep.mubr.msk.f32.mxu0 %vm5977_vm1, %v5976_v31 }
 0x490   : > { %v1235_v34 = vpop.xlane.xlu1 %1234 }
 0x491   : > { %5620 = vrcp.f32 %v1235_v34 }
 0x494   : > { %v1476_v37 = vpop.permute.xlu1 %1475 }
 0x495   : > { %5080 = vmatpush3.msra.mxu0 %v1476_v37 }
 0x496   : > { %5082 = vmatmul.mubr.msk.f32.vlgmr.msra.gmra.mrb[8].mxu0 %vm1202_vm2, %v1246_v36  ;;  %5098 = vmatprep.subr.mxu0 %v5976_v31 }
 0x497   : > { %5100 = vmatprep.mubr.msk.f32.mxu0 %vm5977_vm1, %v5976_v31 }
 0x49b   : > { %v5621_v38 = vpop.eup %5620 }
 0x49c   : > { %v1245_v39 = vmul.f32 %v5621_v38, %v5613_v22 }
 0x49e   : > { %5077 = vmatmul.mubr.msk.f32.vlgmr.msra.gmra.mrb[8].mxu1 %vm1202_vm2, %v1245_v39 }
 0x49f   : > { %5349 = vmatpush3.bf16.msra.mxu1 %v5346_v44  ;;  %v6595_v44 = vld [vmem:[#allocation13 + $0x40] sm:$0xff] }
 0x4a0   : > { %5351 = vmatprep.subr.bf16.mxu1 %v5350_v47 }
 0x4a3   : > { %5353 = vmatpush3.bf16.msra.mxu1 %v5350_v47  ;;  %v5355_v47 = vpack.c.bf16 %v6597_v45, %v6595_v44 }
 0x4a4   : > { %5113 = vmatprep.subr.mxu1 %v5976_v31 }
 0x53c   : > { %v1319_v48 = vpop.f32.mrb[6].mxu1 }
 0x53d   : > { %v5068_v49 = vpop.f32.mrb[7].mxu1  ;;  %5092 = vmatprep.mubr.msk.f32.mxu1 %vm788_vm0, %v1319_v48  ;;  %v6601_v48 = vld [vmem:[#allocation13 + $0x50] sm:$0xff] }
 0x53e   : > { %v6603_v49 = vld [vmem:[#allocation13 + $0x58] sm:$0xff] }
 0x54c   : > { %v1395_v50 = vpop.f32.mrb[6].mxu0 }
 0x54d   : > { %v5073_v51 = vpop.f32.mrb[7].mxu0  ;;  %5093 = vmatmul.mubr.msk.f32.vlgmr.msra.gmra.mrb[10].mxu1 %vm788_vm0, %v1395_v50  ;;  %v5358_v50 = vpack.c.bf16 %v6603_v49, %v6601_v48 }
 0x54e   : > { %v2023_v51 = vsub.s32 1, %v6423_v3 }
 0x569   : > { %v1547_v52 = vpop.f32.mrb[8].mxu0 }
 0x56a   : > { %v5083_v54 = vpop.f32.mrb[9].mxu0 }
 0x56b   : > { %v2030_v54 = vsub.s32 2, %v6423_v3 }
 0x571   : > { %v1471_v55 = vpop.f32.mrb[8].mxu1 }
 0x572   : > { %v5078_v56 = vpop.f32.mrb[9].mxu1  ;;  %5095 = vmatprep.mubr.msk.f32.mxu1 %vm788_vm0, %v1471_v55  ;;  %v2013_v55 = vld [vmem:[%s713_s24] sm:$0xf] }
 0x573   : > { %5096 = vmatmul.mubr.msk.f32.gmra.mrb[12].mxu1 %vm788_vm0, %v1547_v52  ;;  %v2037_v52 = vsub.s32 3, %v6423_v3  ;;  %v2017_v56 = vrot.slane %v2013_v55, %v6429_v9 }
 0x574   : > { %5115 = vmatprep.mubr.msk.f32.mxu1 %vm5977_vm1, %v5976_v31 }
 0x620   : > { %v6538_v57 = vpop.f32.mrb[10].mxu1 }
 0x621   : > { %1731 = vrot.lane.b32.xlu1 %v6538_v57, %s5978_s14  ;;  %v1634_v58 = vpop.f32.mrb[11].mxu1 }
 0x622   : > { %1654 = vrot.lane.b32.xlu0 %v1634_v58, %s5978_s14 }
 0x646   : > { %v6543_v60 = vpop.f32.mrb[12].mxu1 }
 0x647   : > { %1885 = vrot.lane.b32.xlu1 %v6543_v60, %s5978_s14  ;;  %v6547_v61 = vpop.f32.mrb[13].mxu1 }
 0x648   : > { %1808 = vrot.lane.b32.xlu0 %v6547_v61, %s5978_s14 }
 0x693   : > { %v1732_v63 = vpop.permute.xlu1 %1731 }
 0x694   : > { %v1655_v62 = vpop.permute.xlu0 %1654 }
 0x695   : > { %5099 = vmatpush3.xpose.msk.msra.mxu0 %vm788_vm0, %v1655_v62  ;;  %v5541_v62 = vpack.i.bf16 %v6603_v49, %v6601_v48 }
 0x696   : > { %5103 = vmatprep.subr.mxu0 %v5976_v31 }
 0x698   : > { %5101 = vmatmul.mubr.msk.f32.vlgmr.msra.gmra.mrb[10].mxu0 %vm788_vm0, %v1634_v58 }
 0x699   : > { %5104 = vmatpush3.xpose.msk.msra.mxu0 %vm788_vm0, %v1732_v63  ;;  %5105 = vmatprep.mubr.msk.f32.mxu0 %vm5977_vm1, %v5976_v31 }
 0x69a   : > { %5108 = vmatprep.subr.mxu0 %v5976_v31 }
 0x69c   : > { %5106 = vmatmul.mubr.msk.f32.vlgmr.msra.gmra.mrb[12].mxu0 %vm788_vm0, %v6538_v57 }
 0x69d   : > { %5110 = vmatprep.mubr.msk.f32.mxu0 %vm5977_vm1, %v5976_v31 }
 0x6b9   : > { %v1886_v0 = vpop.permute.xlu1 %1885 }
 0x6ba   : > { %v1809_v1 = vpop.permute.xlu0 %1808  ;;  %5114 = vmatpush3.xpose.msk.msra.mxu1 %vm788_vm0, %v1886_v0 }
 0x6bb   : > { %5109 = vmatpush3.xpose.msk.msra.mxu0 %vm788_vm0, %v1809_v1  ;;  %5123 = vmatprep.subr.mxu1 %v5976_v31 }
 0x6bc   : > { %5118 = vmatprep.subr.mxu0 %v5976_v31 }
 0x6bd   : > { %5116 = vmatmul.mubr.msk.f32.vlgmr.msra.gmra.mrb[14].mxu1 %vm788_vm0, %v6543_v60 }
 0x6be   : > { %5111 = vmatmul.mubr.msk.f32.vlgmr.msra.gmra.mrb[14].mxu0 %vm788_vm0, %v6547_v61  ;;  %5125 = vmatprep.mubr.msk.f32.mxu1 %vm5977_vm1, %v5976_v31 }
 0x6bf   : > { %5120 = vmatprep.mubr.msk.f32.mxu0 %vm5977_vm1, %v5976_v31 }
 0x76b   : > { %v1726_v2 = vpop.f32.mrb[10].mxu0 }
 0x76c   : > { %v1961_v4 = vmul.f32 0.17677669, %v1726_v2  ;;  %v5102_v6 = vpop.f32.mrb[11].mxu0 }
 0x76e   : > { %v1965_v7 = vadd.f32 %v1961_v4, %v6488_v41 }
 0x76f   : > { %v1803_v8 = vpop.f32.mrb[12].mxu0 }
 0x770   : > { %v1962_v10 = vmul.f32 0.17677669, %v1803_v8  ;;  %v5107_v11 = vpop.f32.mrb[13].mxu0  ;;  %v1969_v12 = vsel %vm1202_vm2, %v1965_v7, -inf }
 0x771   : > { %1970 = vmax.xlane.f32.xlu0 %v1969_v12 }
 0x772   : > { %v1966_v13 = vadd.f32 %v1962_v10, %v6492_v46 }
 0x774   : > { %v1972_v14 = vsel %vm1202_vm2, %v1966_v13, -inf }
 0x775   : > { %1973 = vmax.xlane.f32.xlu1 %v1972_v14 }
 0x786   : > { %2042 = vrot.lane.b32.xlu1 %v1634_v58, %s5979_s11  ;;  %v2038_v58 = vrot.slane %v2013_v55, %v2037_v52 }
 0x790   : > { %v1957_v15 = vpop.f32.mrb[14].mxu1 }
 0x791   : > { %v1880_v16 = vpop.f32.mrb[14].mxu0  ;;  %v5117_v17 = vpop.f32.mrb[15].mxu1  ;;  %v1964_v18 = vmul.f32 0.17677669, %v1957_v15 }
 0x792   : > { %v1963_v19 = vmul.f32 0.17677669, %v1880_v16  ;;  %v5112_v20 = vpop.f32.mrb[15].mxu0 }
 0x793   : > { %v1968_v22 = vadd.f32 %v1964_v18, %v6501_v59 }
 0x794   : > { %v1967_v41 = vadd.f32 %v1963_v19, %v6497_v53 }
 0x795   : > { %v1978_v46 = vsel %vm1202_vm2, %v1968_v22, -inf }
 0x796   : > { %v1975_v21 = vsel %vm1202_vm2, %v1967_v41, -inf }
 0x797   : > { %1976 = vmax.xlane.f32.xlu0 %v1975_v21 }
 0x79b   : > { %1979 = vmax.xlane.f32.xlu0 %v1978_v46  ;;  %v5980_v46 = vmov 0.0|0.0  }
 0x7fe   : > { %v1971_v23 = vpop.xlane.xlu0 %1970 }
 0x7ff   : > { %v1981_v24 = vsub.f32 %v1965_v7, %v1971_v23 }
 0x801   : > { %v1985_v25 = vmul.f32 1.442695, %v1981_v24 }
 0x802   : > { %v1974_v26 = vpop.xlane.xlu1 %1973 }
 0x803   : > { %5622 = vpow2.f32 %v1985_v25  ;;  %v1982_v27 = vsub.f32 %v1966_v13, %v1974_v26 }
 0x805   : > { %v1987_v28 = vmul.f32 1.442695, %v1982_v27  ;;  %v6650_v27 = vld [vmem:[%s6401_s1] sm:$0xff]  ;;  %s721_s1 = scalar_lea.vmem %s6987_s20, %s6609_s22  ;;  %s5886_s20 = sshll.u32 %s5981_s29, 4  ;;  %s5887_s20 = int_to_ptr.vmem [resolvable:$false] %s5886_s20 }
 0x806   : > { %v2043_v29 = vpop.permute.xlu1 %2042 }
 0x807   : > { %5624 = vpow2.f32 %v1987_v28  ;;  %5119 = vmatpush3.msra.mxu0 %v2043_v29 }
 0x808   : > { %5128 = vmatprep.subr.mxu0 %v5976_v31 }
 0x80d   : > { %v5623_v53 = vpop.eup %5622 }
 0x80e   : > { %v1993_v30 = vsel %vm1202_vm2, %v5623_v53, 0.0 }
 0x80f   : > { %1994 = vadd.xlane.f32.xlu1 %v1993_v30 }
 0x811   : > { %v5625_v59 = vpop.eup %5624 }
 0x812   : > { %v1996_v32 = vsel %vm1202_vm2, %v5625_v59, 0.0 }
 0x813   : > { %1997 = vadd.xlane.f32.xlu0 %v1996_v32 }
 0x820   : > { %2194 = vrot.lane.b32.xlu1 %v6547_v61, %s5979_s11  ;;  %v5536_v61 = vpack.i.bf16 %v6597_v45, %v6595_v44 }
 0x824   : > { %v1977_v33 = vpop.xlane.xlu0 %1976 }
 0x825   : > { %v1983_v37 = vsub.f32 %v1967_v41, %v1977_v33 }
 0x827   : > { %v1989_v38 = vmul.f32 1.442695, %v1983_v37 }
 0x828   : > { %v1980_v34 = vpop.xlane.xlu0 %1979 }
 0x829   : > { %v1984_v35 = vsub.f32 %v1968_v22, %v1980_v34 }
 0x82b   : > { %v1991_v36 = vmul.f32 1.442695, %v1984_v35 }
 0x82d   : > { %5626 = vpow2.f32 %v1991_v36 }
 0x82e   : > { %5628 = vpow2.f32 %v1989_v38 }
 0x837   : > { %v5627_v39 = vpop.eup %5626 }
 0x838   : > { %v2002_v40 = vsel %vm1202_vm2, %v5627_v39, 0.0  ;;  %v5629_v42 = vpop.eup %5628 }
 0x839   : > { %2003 = vadd.xlane.f32.xlu0 %v2002_v40  ;;  %v1999_v43 = vsel %vm1202_vm2, %v5629_v42, 0.0 }
 0x844   : > { %2000 = vadd.xlane.f32.xlu1 %v1999_v43 }
 0x84f   : > { %2118 = vrot.lane.b32.xlu0 %v6538_v57, %s5979_s11  ;;  %v2024_v57 = vrot.slane %v2013_v55, %v2023_v51 }
 0x853   : > { %2019 = vbcast.lane.b32.xlu0 %v2017_v56, 256 }
 0x855   : > { %2270 = vrot.lane.b32.xlu1 %v6543_v60, %s5979_s11  ;;  %v2031_v60 = vrot.slane %v2013_v55, %v2030_v54 }
 0x857   : > { %2033 = vbcast.lane.b32.xlu0 %v2031_v60, 256 }
 0x859   : > { %2026 = vbcast.lane.b32.xlu1 %v2024_v57, 256 }
 0x85b   : > { %5537 = vrot.lane.b32.xlu0 %v5536_v61, %s5978_s14 }
 0x85d   : > { %2040 = vbcast.lane.b32.xlu1 %v2038_v58, 256 }
 0x861   : > { %5542 = vrot.lane.b32.xlu1 %v5541_v62, %s5978_s14 }
 0x89c   : > { %v1995_v3 = vpop.xlane.xlu1 %1994 }
 0x89d   : > { %5630 = vrcp.f32 %v1995_v3 }
 0x8a0   : > { %v2195_v1 = vpop.permute.xlu1 %2194  ;;  %v1998_v2 = vpop.xlane.xlu0 %1997 }
 0x8a1   : > { %5632 = vrcp.f32 %v1998_v2 }
 0x8a7   : > { %v5631_v63 = vpop.eup %5630 }
 0x8a8   : > { %v2009_v0 = vmul.f32 %v5631_v63, %v5623_v53 }
 0x8aa   : > { %5121 = vmatmul.mubr.msk.f32.vlgmr.msra.gmra.mrb[16].mxu0 %vm1202_vm2, %v2009_v0 }
 0x8ab   : > { %5129 = vmatpush3.msra.mxu0 %v2195_v1  ;;  %5130 = vmatprep.mubr.msk.f32.mxu0 %vm5977_vm1, %v5976_v31  ;;  %v5633_v6 = vpop.eup %5632 }
 0x8ac   : > { %v2010_v7 = vmul.f32 %v5633_v6, %v5625_v59  ;;  %5354 = vmatprep.subr.bf16.mxu0 %v5980_v46 }
 0x8c6   : > { %v2004_v4 = vpop.xlane.xlu0 %2003 }
 0x8c7   : > { %5634 = vrcp.f32 %v2004_v4 }
 0x8ca   : > { %v2119_v8 = vpop.permute.xlu0 %2118 }
 0x8cb   : > { %5124 = vmatpush3.msra.mxu1 %v2119_v8 }
 0x8cc   : > { %5126 = vmatmul.mubr.msk.f32.vlgmr.msra.gmra.mrb[16].mxu1 %vm1202_vm2, %v2010_v7  ;;  %5133 = vmatprep.subr.mxu1 %v5976_v31 }
 0x8cd   : > { %5135 = vmatprep.mubr.msk.f32.mxu1 %vm5977_vm1, %v5976_v31 }
 0x8ce   : > { %v2020_v16 = vpop.permute.xlu0 %2019 }
 0x8d1   : > { %v2001_v10 = vpop.xlane.xlu1 %2000  ;;  %v5635_v11 = vpop.eup %5634 }
 0x8d2   : > { %5636 = vrcp.f32 %v2001_v10  ;;  %v2012_v12 = vmul.f32 %v5635_v11, %v5627_v39  ;;  %v2034_v18 = vpop.permute.xlu0 %2033 }
 0x8d5   : > { %v2271_v13 = vpop.permute.xlu1 %2270 }
 0x8d6   : > { %5134 = vmatpush3.msra.mxu1 %v2271_v13  ;;  %v5538_v20 = vpop.permute.xlu0 %5537 }
 0x8d7   : > { %5136 = vmatmul.mubr.msk.f32.vlgmr.msra.gmra.mrb[18].mxu1 %vm1202_vm2, %v2012_v12  ;;  %v5540_v41 = vunpack.i.h.bf16 %v5538_v20  ;;  %v5539_v21 = vunpack.i.l.bf16 %v5538_v20  ;;  %5360 = vmatprep.subr.bf16.mxu1 %v5980_v46 }
 0x8d8   : > { %5157 = vmatprep.mubr.msk.f32.mxu1 %vm5977_vm1, %v5976_v31 }
 0x8d9   : > { %v2027_v17 = vpop.permute.xlu1 %2026  ;;  %v5361_v22 = vpack.c.bf16 %v5540_v41, %v5539_v21 }
 0x8db   : > { %5362 = vmatpush3.bf16.msra.mxu1 %v5361_v22 }
 0x8dc   : > { %v5637_v14 = vpop.eup %5636  ;;  %5363 = vmatprep.subr.bf16.mxu1 %v5980_v46 }
 0x8dd   : > { %v2011_v15 = vmul.f32 %v5637_v14, %v5629_v42  ;;  %v2041_v19 = vpop.permute.xlu1 %2040 }
 0x8df   : > { %5131 = vmatmul.mubr.msk.f32.vlgmr.msra.gmra.mrb[18].mxu0 %vm1202_vm2, %v2011_v15 }
 0x8e0   : > { %5146 = vmatprep.mubr.msk.f32.mxu0 %vm5977_vm1, %v5976_v31  ;;  %5356 = vmatpush3.bf16.msra.mxu0 %v5355_v47 }
 0x8e1   : > { %v5543_v23 = vpop.permute.xlu1 %5542  ;;  %5357 = vmatprep.subr.bf16.mxu0 %v5980_v46 }
 0x8e2   : > { %v5545_v24 = vunpack.i.h.bf16 %v5543_v23  ;;  %v5544_v25 = vunpack.i.l.bf16 %v5543_v23 }
 0x8e4   : > { %v5364_v26 = vpack.c.bf16 %v5545_v24, %v5544_v25  ;;  %5359 = vmatpush3.bf16.msra.mxu0 %v5358_v50 }
 0x8e5   : > { %5160 = vmatprep.subr.mxu0 %v5976_v31 }
 0x8e6   : > { %5365 = vmatpush3.bf16.msra.mxu1 %v5364_v26 }
 0x8e7   : > { %5165 = vmatprep.subr.mxu1 %v5976_v31 }
 0x8e9   : > { %5158 = vmatmul.mubr.msk.f32.vlgmr.msra.gmra.mrb[20].mxu1 %vm788_vm0, %v6650_v27 }
 0x8ea   : > { %5167 = vmatprep.mubr.msk.f32.mxu1 %vm5977_vm1, %v5976_v31 }
 0x97d   : > { %v2114_v28 = vpop.f32.mrb[16].mxu0 }
 0x97e   : > { %v5122_v29 = vpop.f32.mrb[17].mxu0  ;;  %v2115_v53 = vadd.f32 %v2114_v28, %v2020_v16  ;;  %v2719_v28 = vld [vmem:[#allocation13 + $0x60] sm:$0xff] }
 0x97f   : > { %v2720_v29 = vld [vmem:[#allocation13 + $0x68] sm:$0xff] }
 0x980   : > { %v2346_v30 = vsel %vm788_vm0, %v2115_v53, -inf  ;;  %v2721_v53 = vld [vmem:[#allocation13 + $0x70] sm:$0xff] }
 0x981   : > { %v2347_v59 = vrot.slane %v2346_v30, 4 }
 0x983   : > { %v2348_v32 = vmax.f32 %v2346_v30, %v2347_v59  ;;  %v5546_v30 = vpack.i.bf16 %v2720_v29, %v2719_v28  ;;  %v5367_v59 = vpack.c.bf16 %v2720_v29, %v2719_v28 }
 0x985   : > { %v2349_v36 = vrot.slane %v2348_v32, 2 }
 0x987   : > { %v2350_v39 = vmax.f32 %v2348_v32, %v2349_v36  ;;  %v2722_v32 = vld [vmem:[#allocation13 + $0x78] sm:$0xff] }
 0x989   : > { %v2351_v43 = vrot.slane %v2350_v39, 1 }
 0x98b   : > { %v2352_v50 = vmax.f32 %v2350_v39, %v2351_v43 }
 0x99f   : > { %v2190_v33 = vpop.f32.mrb[16].mxu1 }
 0x9a0   : > { %v2191_v34 = vadd.f32 %v2190_v33, %v2027_v17  ;;  %v5127_v35 = vpop.f32.mrb[17].mxu1  ;;  %v6672_v17 = vld [vmem:[%s717_s16] sm:$0xf]  ;;  %v5551_v33 = vpack.i.bf16 %v2722_v32, %v2721_v53  ;;  %s6860_s16 = scalar_lea.hbm %s6994_s9, %s4891_s8 }
 0x9a2   : > { %v2353_v37 = vsel %vm788_vm0, %v2191_v34, -inf  ;;  %v5370_v34 = vpack.c.bf16 %v2722_v32, %v2721_v53 }
 0x9a3   : > { %v2354_v38 = vrot.slane %v2353_v37, 4 }
 0x9a5   : > { %v2355_v40 = vmax.f32 %v2353_v37, %v2354_v38 }
 0x9a7   : > { %v2356_v42 = vrot.slane %v2355_v40, 2 }
 0x9a9   : > { %v2357_v44 = vmax.f32 %v2355_v40, %v2356_v42 }
 0x9aa   : > { %v2342_v45 = vpop.f32.mrb[18].mxu1 }
 0x9ab   : > { %v2358_v47 = vrot.slane %v2357_v44, 1  ;;  %v2343_v48 = vadd.f32 %v2342_v45, %v2041_v19  ;;  %v5137_v49 = vpop.f32.mrb[19].mxu1 }
 0x9ad   : > { %v2359_v51 = vmax.f32 %v2357_v44, %v2358_v47  ;;  %v2367_v52 = vsel %vm788_vm0, %v2343_v48, -inf }
 0x9ae   : > { %v2368_v54 = vrot.slane %v2367_v52, 4 }
 0x9af   : > { %v2386_v55 = vsel %vm2385_vm3, %v2359_v51, %v2352_v50 }
 0x9b0   : > { %v2369_v56 = vmax.f32 %v2367_v52, %v2368_v54 }
 0x9b2   : > { %v2266_v57 = vpop.f32.mrb[18].mxu0  ;;  %v2370_v61 = vrot.slane %v2369_v56, 2 }
 0x9b3   : > { %v2267_v58 = vadd.f32 %v2266_v57, %v2034_v18  ;;  %v5132_v60 = vpop.f32.mrb[19].mxu0 }
 0x9b4   : > { %v2371_v0 = vmax.f32 %v2369_v56, %v2370_v61 }
 0x9b5   : > { %v2360_v62 = vsel %vm788_vm0, %v2267_v58, -inf }
 0x9b6   : > { %v2361_v3 = vrot.slane %v2360_v62, 4  ;;  %v2372_v4 = vrot.slane %v2371_v0, 1 }
 0x9b8   : > { %v2362_v63 = vmax.f32 %v2360_v62, %v2361_v3  ;;  %v2373_v8 = vmax.f32 %v2371_v0, %v2372_v4  ;;  %v3050_v0 = vld [vmem:[#allocation13 + $0x80] sm:$0xff] }
 0x9ba   : > { %v2363_v1 = vrot.slane %v2362_v63, 2 }
 0x9bc   : > { %v2364_v2 = vmax.f32 %v2362_v63, %v2363_v1  ;;  %v2548_v12 = vpop.f32.mrb[20].mxu1  ;;  %v3051_v1 = vld [vmem:[#allocation13 + $0x88] sm:$0xff] }
 0x9bd   : > { %v5159_v13 = vpop.f32.mrb[21].mxu1  ;;  %v5556_v4 = vpack.i.bf16 %v3051_v1, %v3050_v0 }
 0x9be   : > { %v2365_v6 = vrot.slane %v2364_v2, 1 }
 0x9c0   : > { %v2366_v7 = vmax.f32 %v2364_v2, %v2365_v6  ;;  %v3052_v2 = vld [vmem:[#allocation13 + $0x90] sm:$0xff]  ;;  %v5379_v6 = vpack.c.bf16 %v3051_v1, %v3050_v0 }
 0x9c2   : > { %v2388_v10 = vsel %vm2387_vm4, %v2366_v7, %v2386_v55  ;;  %v3053_v7 = vld [vmem:[#allocation13 + $0x98] sm:$0xff] }
 0x9c3   : > { %v2390_v11 = vsel %vm2389_vm5, %v2373_v8, %v2388_v10  ;;  %v5561_v8 = vpack.i.bf16 %v3053_v7, %v3052_v2  ;;  %v5382_v10 = vpack.c.bf16 %v3053_v7, %v3052_v2 }
 0x9c4   : > { %5147 = vmatmul.mubr.msk.f32.vlgmr.msra.gmra.mrb[20].mxu0 %vm788_vm0, %v2390_v11 }
 0x9c5   : > { %5162 = vmatprep.mubr.msk.f32.mxu0 %vm5977_vm1, %v5976_v31  ;;  %5161 = vmatpush3.xpose.msk.msra.mxu0 %vm788_vm0, %v2548_v12 }
 0x9c6   : > { %5366 = vmatprep.subr.bf16.mxu0 %v5980_v46 }
 0xa97   : > { %v2459_v14 = vpop.f32.mrb[20].mxu0 }
 0xa98   : > { %v5148_v15 = vpop.f32.mrb[21].mxu0  ;;  %5163 = vmatmul.mubr.msk.f32.vlgmr.msra.gmra.mrb[22].mxu0 %vm788_vm0, %v2459_v14 }
 0xa99   : > { %5178 = vmatprep.mubr.msk.f32.mxu0 %vm5977_vm1, %v5976_v31  ;;  %5368 = vmatpush3.bf16.msra.mxu0 %v5367_v59 }
 0xa9a   : > { %5369 = vmatprep.subr.bf16.mxu0 %v5980_v46 }
 0xa9d   : > { %5371 = vmatpush3.bf16.msra.mxu0 %v5370_v34 }
 0xa9e   : > { %5192 = vmatprep.subr.mxu0 %v5976_v31 }
 0xb6b   : > { %v2624_v16 = vpop.f32.mrb[22].mxu0 }
 0xb6c   : > { %v2628_v18 = vmul.f32 0.17677669, %v2624_v16  ;;  %v5164_v19 = vpop.f32.mrb[23].mxu0 }
 0xb6e   : > { %v2629_v20 = vadd.f32 %v2628_v18, %v6672_v17 }
 0xb70   : > { %v2631_v41 = vsel %vm2630_vm6, %v2629_v20, -inf }
 0xb71   : > { %2632 = vmax.xlane.f32.xlu0 %v2631_v41 }
 0xb87   : > { %2642 = vrot.lane.b32.xlu0 %v2548_v12, %s5978_s14 }
 0xb8b   : > { %5552 = vrot.lane.b32.xlu0 %v5551_v33, %s5978_s14 }
 0xbfe   : > { %v2633_v21 = vpop.xlane.xlu0 %2632 }
 0xbff   : > { %v2634_v22 = vsub.f32 %v2629_v20, %v2633_v21 }
 0xc01   : > { %v2635_v23 = vmul.f32 1.442695, %v2634_v22  ;;  %v6714_v22 = vld [vmem:[%s6403_s0] sm:$0xff] }
 0xc02   : > { %v2643_v24 = vpop.permute.xlu0 %2642 }
 0xc03   : > { %5638 = vpow2.f32 %v2635_v23  ;;  %5166 = vmatpush3.msra.mxu1 %v2643_v24 }
 0xc04   : > { %5372 = vmatprep.subr.bf16.mxu1 %v5980_v46 }
 0xc06   : > { %v5553_v39 = vpop.permute.xlu0 %5552 }
 0xc07   : > { %v5555_v43 = vunpack.i.h.bf16 %v5553_v39  ;;  %v5554_v44 = vunpack.i.l.bf16 %v5553_v39 }
 0xc09   : > { %v5376_v47 = vpack.c.bf16 %v5555_v43, %v5554_v44  ;;  %v3383_v43 = vld [vmem:[#allocation13 + $0xa8] sm:$0xff]  ;;  %v3384_v44 = vld [vmem:[#allocation13 + $0xb0] sm:$0xff] }
 0xc0d   : > { %v5639_v25 = vpop.eup %5638 }
 0xc0e   : > { %v2637_v26 = vsel %vm2630_vm6, %v5639_v25, 0.0 }
 0xc0f   : > { %2638 = vadd.xlane.f32.xlu1 %v2637_v26 }
 0xc20   : > { %5547 = vrot.lane.b32.xlu1 %v5546_v30, %s5978_s14  ;;  %v6733_v30 = vld [vmem:[%s721_s1] sm:$0xf]  ;;  %s5888_s1 = scalar_lea.vmem %s5887_s20, 1024 }
 0xc9c   : > { %v2639_v35 = vpop.xlane.xlu1 %2638 }
 0xc9d   : > { %5640 = vrcp.f32 %v2639_v35 }
 0xca0   : > { %v5548_v36 = vpop.permute.xlu1 %5547 }
 0xca1   : > { %v5550_v37 = vunpack.i.h.bf16 %v5548_v36  ;;  %v5549_v38 = vunpack.i.l.bf16 %v5548_v36 }
 0xca3   : > { %v5373_v42 = vpack.c.bf16 %v5550_v37, %v5549_v38 }
 0xca7   : > { %v5641_v40 = vpop.eup %5640 }
 0xca8   : > { %v2641_v45 = vmul.f32 %v5641_v40, %v5639_v25 }
 0xcaa   : > { %5168 = vmatmul.mubr.msk.f32.vlgmr.msra.gmra.mrb[22].mxu1 %vm1202_vm2, %v2641_v45 }
 0xcab   : > { %5374 = vmatpush3.bf16.msra.mxu1 %v5373_v42  ;;  %5189 = vmatprep.mubr.msk.f32.mxu1 %vm5977_vm1, %v5976_v31  ;;  %v3382_v42 = vld [vmem:[#allocation13 + $0xa0] sm:$0xff] }
 0xcac   : > { %5375 = vmatprep.subr.bf16.mxu1 %v5980_v46  ;;  %v5566_v45 = vpack.i.bf16 %v3383_v43, %v3382_v42 }
 0xcaf   : > { %5377 = vmatpush3.bf16.msra.mxu1 %v5376_v47  ;;  %v5391_v47 = vpack.c.bf16 %v3383_v43, %v3382_v42 }
 0xcb0   : > { %5197 = vmatprep.subr.mxu1 %v5976_v31 }
 0xcb2   : > { %5190 = vmatmul.mubr.msk.f32.vlgmr.msra.gmra.mrb[24].mxu1 %vm788_vm0, %v6650_v27 }
 0xcb3   : > { %5199 = vmatprep.mubr.msk.f32.mxu1 %vm5977_vm1, %v5976_v31 }
 0xd7d   : > { %v2714_v48 = vpop.f32.mrb[22].mxu1 }
 0xd7e   : > { %v5169_v49 = vpop.f32.mrb[23].mxu1  ;;  %5179 = vmatmul.mubr.msk.f32.vlgmr.msra.gmra.mrb[24].mxu0 %vm788_vm0, %v2714_v48  ;;  %v3385_v48 = vld [vmem:[#allocation13 + $0xb8] sm:$0xff] }
 0xd7f   : > { %5194 = vmatprep.mubr.msk.f32.mxu0 %vm5977_vm1, %v5976_v31  ;;  %v5571_v49 = vpack.i.bf16 %v3385_v48, %v3384_v44 }
 0xd85   : > { %v2878_v50 = vpop.f32.mrb[24].mxu1 }
 0xd86   : > { %v5191_v51 = vpop.f32.mrb[25].mxu1  ;;  %5193 = vmatpush3.xpose.msk.msra.mxu0 %vm788_vm0, %v2878_v50 }
 0xd87   : > { %5378 = vmatprep.subr.bf16.mxu0 %v5980_v46 }
 0xe51   : > { %v2792_v52 = vpop.f32.mrb[24].mxu0 }
 0xe52   : > { %v5180_v54 = vpop.f32.mrb[25].mxu0  ;;  %5195 = vmatmul.mubr.msk.f32.vlgmr.msra.gmra.mrb[26].mxu0 %vm788_vm0, %v2792_v52 }
 0xe53   : > { %5210 = vmatprep.mubr.msk.f32.mxu0 %vm5977_vm1, %v5976_v31  ;;  %5380 = vmatpush3.bf16.msra.mxu0 %v5379_v6 }
 0xe54   : > { %5381 = vmatprep.subr.bf16.mxu0 %v5980_v46 }
 0xe57   : > { %5383 = vmatpush3.bf16.msra.mxu0 %v5382_v10 }
 0xe58   : > { %5224 = vmatprep.subr.mxu0 %v5976_v31 }
 0xf25   : > { %v2954_v27 = vpop.f32.mrb[26].mxu0 }
 0xf26   : > { %v2958_v55 = vmul.f32 0.17677669, %v2954_v27  ;;  %v5196_v56 = vpop.f32.mrb[27].mxu0 }
 0xf28   : > { %v2959_v57 = vadd.f32 %v2958_v55, %v6672_v17 }
 0xf2a   : > { %v2960_v58 = vsel %vm2630_vm6, %v2959_v57, -inf }
 0xf2b   : > { %2961 = vmax.xlane.f32.xlu1 %v2960_v58 }
 0xf3c   : > { %5557 = vrot.lane.b32.xlu1 %v5556_v4, %s5978_s14 }
 0xf40   : > { %5562 = vrot.lane.b32.xlu1 %v5561_v8, %s5978_s14 }
 0xfb8   : > { %v2962_v60 = vpop.xlane.xlu1 %2961 }
 0xfb9   : > { %v2963_v61 = vsub.f32 %v2959_v57, %v2962_v60 }
 0xfbb   : > { %v2964_v62 = vmul.f32 1.442695, %v2963_v61 }
 0xfbc   : > { %v5558_v12 = vpop.permute.xlu1 %5557 }
 0xfbd   : > { %5642 = vpow2.f32 %v2964_v62  ;;  %v5560_v14 = vunpack.i.h.bf16 %v5558_v12  ;;  %v5559_v15 = vunpack.i.l.bf16 %v5558_v12 }
 0xfbf   : > { %v5385_v18 = vpack.c.bf16 %v5560_v14, %v5559_v15 }
 0xfc0   : > { %v5563_v16 = vpop.permute.xlu1 %5562 }
 0xfc1   : > { %v5565_v19 = vunpack.i.h.bf16 %v5563_v16  ;;  %v5564_v20 = vunpack.i.l.bf16 %v5563_v16 }
 0xfc3   : > { %v5388_v21 = vpack.c.bf16 %v5565_v19, %v5564_v20  ;;  %v3716_v19 = vld [vmem:[#allocation13 + $0xd0] sm:$0xff] }
 0xfc7   : > { %v5643_v3 = vpop.eup %5642 }
 0xfc8   : > { %v2966_v63 = vsel %vm2630_vm6, %v5643_v3, 0.0 }
 0xfc9   : > { %2967 = vadd.xlane.f32.xlu0 %v2966_v63 }
 0xfdf   : > { %2971 = vrot.lane.b32.xlu0 %v2878_v50, %s5978_s14  ;;  %v5394_v50 = vpack.c.bf16 %v3385_v48, %v3384_v44 }
0x1056   : > { %v2968_v11 = vpop.xlane.xlu0 %2967 }
0x1057   : > { %5644 = vrcp.f32 %v2968_v11 }
0x105a   : > { %v2972_v13 = vpop.permute.xlu0 %2971 }
0x105b   : > { %5198 = vmatpush3.msra.mxu1 %v2972_v13 }
0x105c   : > { %5384 = vmatprep.subr.bf16.mxu1 %v5980_v46 }
0x1061   : > { %v5645_v17 = vpop.eup %5644 }
0x1062   : > { %v2970_v41 = vmul.f32 %v5645_v17, %v5643_v3  ;;  %v3714_v17 = vld [vmem:[#allocation13 + $0xc0] sm:$0xff] }
0x1064   : > { %5200 = vmatmul.mubr.msk.f32.vlgmr.msra.gmra.mrb[26].mxu1 %vm1202_vm2, %v2970_v41 }
0x1065   : > { %5386 = vmatpush3.bf16.msra.mxu1 %v5385_v18  ;;  %5221 = vmatprep.mubr.msk.f32.mxu1 %vm5977_vm1, %v5976_v31  ;;  %v3715_v18 = vld [vmem:[#allocation13 + $0xc8] sm:$0xff] }
0x1066   : > { %5387 = vmatprep.subr.bf16.mxu1 %v5980_v46  ;;  %v5576_v20 = vpack.i.bf16 %v3715_v18, %v3714_v17  ;;  %v5403_v41 = vpack.c.bf16 %v3715_v18, %v3714_v17 }
0x1069   : > { %5389 = vmatpush3.bf16.msra.mxu1 %v5388_v21  ;;  %v3717_v21 = vld [vmem:[#allocation13 + $0xd8] sm:$0xff] }
0x106a   : > { %5229 = vmatprep.subr.mxu1 %v5976_v31 }
0x106c   : > { %5222 = vmatmul.mubr.msk.f32.vlgmr.msra.gmra.mrb[28].mxu1 %vm788_vm0, %v6714_v22 }
0x106d   : > { %5231 = vmatprep.mubr.msk.f32.mxu1 %vm5977_vm1, %v5976_v31 }
0x1137   : > { %v3043_v23 = vpop.f32.mrb[26].mxu1 }
0x1138   : > { %v5201_v24 = vpop.f32.mrb[27].mxu1  ;;  %5211 = vmatmul.mubr.msk.f32.vlgmr.msra.gmra.mrb[28].mxu0 %vm788_vm0, %v3043_v23  ;;  %v5406_v23 = vpack.c.bf16 %v3717_v21, %v3716_v19 }
0x1139   : > { %5226 = vmatprep.mubr.msk.f32.mxu0 %vm5977_vm1, %v5976_v31 }
0x113f   : > { %v3212_v25 = vpop.f32.mrb[28].mxu1 }
0x1140   : > { %v5223_v26 = vpop.f32.mrb[29].mxu1  ;;  %5225 = vmatpush3.xpose.msk.msra.mxu0 %vm788_vm0, %v3212_v25 }
0x1141   : > { %5390 = vmatprep.subr.bf16.mxu0 %v5980_v46 }
0x120b   : > { %v3123_v28 = vpop.f32.mrb[28].mxu0 }
0x120c   : > { %v5212_v29 = vpop.f32.mrb[29].mxu0  ;;  %5227 = vmatmul.mubr.msk.f32.vlgmr.msra.gmra.mrb[30].mxu0 %vm788_vm0, %v3123_v28 }
0x120d   : > { %5242 = vmatprep.mubr.msk.f32.mxu0 %vm5977_vm1, %v5976_v31  ;;  %5392 = vmatpush3.bf16.msra.mxu0 %v5391_v47 }
0x120e   : > { %5393 = vmatprep.subr.bf16.mxu0 %v5980_v46 }
0x1211   : > { %5395 = vmatpush3.bf16.msra.mxu0 %v5394_v50 }
0x1212   : > { %5256 = vmatprep.subr.mxu0 %v5976_v31 }
0x12df   : > { %v3288_v53 = vpop.f32.mrb[30].mxu0 }
0x12e0   : > { %v3292_v59 = vmul.f32 0.17677669, %v3288_v53  ;;  %v5228_v32 = vpop.f32.mrb[31].mxu0 }
0x12e2   : > { %v3293_v33 = vadd.f32 %v3292_v59, %v6733_v30 }
0x12e4   : > { %v3294_v34 = vsel %vm2630_vm6, %v3293_v33, -inf }
0x12e5   : > { %3295 = vmax.xlane.f32.xlu0 %v3294_v34 }
0x12fb   : > { %3305 = vrot.lane.b32.xlu0 %v3212_v25, %s5978_s14 }
0x12ff   : > { %5572 = vrot.lane.b32.xlu0 %v5571_v49, %s5978_s14 }
0x1372   : > { %v3296_v35 = vpop.xlane.xlu0 %3295 }
0x1373   : > { %v3297_v36 = vsub.f32 %v3293_v33, %v3296_v35 }
0x1375   : > { %v3298_v37 = vmul.f32 1.442695, %v3297_v36  ;;  %v3710_v36 = vld [vmem:[%s6410_s19] sm:$0xff] }
0x1376   : > { %v3306_v38 = vpop.permute.xlu0 %3305 }
0x1377   : > { %5646 = vpow2.f32 %v3298_v37  ;;  %5230 = vmatpush3.msra.mxu1 %v3306_v38  ;;  %v6773_v37 = vld [vmem:[%s6410_s19 + $0x8] sm:$0xff]  ;;  %s725_s19 = scalar_lea.vmem %s6990_s15, %s6609_s22  ;;  %s709_s22 = scalar_lea.vmem [#allocation14], %s6384_s23 }
0x1378   : > { %5396 = vmatprep.subr.bf16.mxu1 %v5980_v46  ;;  %v6797_v50 = vld [vmem:[%s725_s19] sm:$0xf]  ;;  %s4543_s24 = sshll.u32 %s709_s22, 4  ;;  %s6862_s24 = int_to_ptr.vmem [resolvable:$true] %s4543_s24 }
0x1379   : > { %s5882_s3 = scalar_lea.vmem %s6862_s24, 512  ;;  %p5889_p2 = scmp.lt.s32.totalorder %s6862_s24, %s5887_s20 }
0x137a   : > { %v5573_v55 = vpop.permute.xlu0 %5572  ;;  %p5883_p7 = scmp.ne.s32.totalorder %s6862_s24, %s5882_s3  ;;  %p5890_p12 = scmp.lt.s32.totalorder %s5888_s1, %s5882_s3 }
0x137b   : > { %v5575_v58 = vunpack.i.h.bf16 %v5573_v55  ;;  %v5574_v60 = vunpack.i.l.bf16 %v5573_v55 }
0x137c   : > { %p5884_p3 = pnand %p5883_p7, %p6995_p4  ;;  %p5891_p13 = por %p5890_p12, %p5889_p2 }
0x137d   : > { %v5400_v62 = vpack.c.bf16 %v5575_v58, %v5574_v60 }
0x137e   : > { %p5885_p5 = pneg %p5884_p3 }
0x1380   : > { %p5892_p8 = pnand %p5891_p13, %p5885_p5 }
0x1381   : > { %v5647_v39 = vpop.eup %5646 }
0x1382   : > { %v3300_v40 = vsel %vm2630_vm6, %v5647_v39, 0.0 }
0x1383   : > { %3301 = vadd.xlane.f32.xlu1 %v3300_v40 }
0x1394   : > { %5567 = vrot.lane.b32.xlu1 %v5566_v45, %s5978_s14 }
0x1410   : > { %v3302_v51 = vpop.xlane.xlu1 %3301 }
0x1411   : > { %5648 = vrcp.f32 %v3302_v51 }
0x1414   : > { %v5568_v52 = vpop.permute.xlu1 %5567 }
0x1415   : > { %v5570_v54 = vunpack.i.h.bf16 %v5568_v52  ;;  %v5569_v27 = vunpack.i.l.bf16 %v5568_v52 }
0x1417   : > { %v5397_v57 = vpack.c.bf16 %v5570_v54, %v5569_v27 }
0x141b   : > { %v5649_v56 = vpop.eup %5648 }
0x141c   : > { %v3304_v61 = vmul.f32 %v5649_v56, %v5647_v39 }
0x141e   : > { %5232 = vmatmul.mubr.msk.f32.vlgmr.msra.gmra.mrb[30].mxu1 %vm1202_vm2, %v3304_v61 }
0x141f   : > { %5398 = vmatpush3.bf16.msra.mxu1 %v5397_v57  ;;  %5253 = vmatprep.mubr.msk.f32.mxu1 %vm5977_vm1, %v5976_v31 }
0x1420   : > { %5399 = vmatprep.subr.bf16.mxu1 %v5980_v46 }
0x1423   : > { %5401 = vmatpush3.bf16.msra.mxu1 %v5400_v62 }
0x1424   : > { %5261 = vmatprep.subr.mxu1 %v5976_v31 }
0x1426   : > { %5254 = vmatmul.mubr.msk.f32.vlgmr.msra.gmra.mrb[32].mxu1 %vm788_vm0, %v6714_v22  ;;  %v5581_v22 = vpack.i.bf16 %v3717_v21, %v3716_v19 }
0x1427   : > { %5263 = vmatprep.mubr.msk.f32.mxu1 %vm5977_vm1, %v5976_v31 }
0x14f1   : > { %v3377_v3 = vpop.f32.mrb[30].mxu1 }
0x14f2   : > { %v5233_v63 = vpop.f32.mrb[31].mxu1  ;;  %5243 = vmatmul.mubr.msk.f32.vlgmr.msra.gmra.mrb[32].mxu0 %vm788_vm0, %v3377_v3 }
0x14f3   : > { %5258 = vmatprep.mubr.msk.f32.mxu0 %vm5977_vm1, %v5976_v31 }
0x14f9   : > { %v3541_v0 = vpop.f32.mrb[32].mxu1 }
0x14fa   : > { %v5255_v1 = vpop.f32.mrb[33].mxu1  ;;  %5257 = vmatpush3.xpose.msk.msra.mxu0 %vm788_vm0, %v3541_v0 }
0x14fb   : > { %5402 = vmatprep.subr.bf16.mxu0 %v5980_v46  ;;  %v4063_v1 = vld [vmem:[#allocation13 + $0xe8] sm:$0xff] }
0x15c5   : > { %v3455_v2 = vpop.f32.mrb[32].mxu0 }
0x15c6   : > { %v5244_v4 = vpop.f32.mrb[33].mxu0  ;;  %5259 = vmatmul.mubr.msk.f32.vlgmr.msra.gmra.mrb[34].mxu0 %vm788_vm0, %v3455_v2  ;;  %v4064_v2 = vld [vmem:[#allocation13 + $0xf0] sm:$0xff] }
0x15c7   : > { %5274 = vmatprep.mubr.msk.f32.mxu0 %vm5977_vm1, %v5976_v31  ;;  %5404 = vmatpush3.bf16.msra.mxu0 %v5403_v41 }
0x15c8   : > { %5405 = vmatprep.subr.bf16.mxu0 %v5980_v46 }
0x15cb   : > { %5407 = vmatpush3.bf16.msra.mxu0 %v5406_v23 }
0x15cc   : > { %5416 = vmatprep.subr.bf16.mxu0 %v5980_v46 }
0x1699   : > { %v3617_v6 = vpop.f32.mrb[34].mxu0 }
0x169a   : > { %v3621_v7 = vmul.f32 0.17677669, %v3617_v6  ;;  %v5260_v8 = vpop.f32.mrb[35].mxu0 }
0x169c   : > { %v3622_v10 = vadd.f32 %v3621_v7, %v6733_v30  ;;  %v4065_v7 = vld [vmem:[#allocation13 + $0xf8] sm:$0xff] }
0x169d   : > { %v5596_v8 = vpack.i.bf16 %v4065_v7, %v4064_v2 }
0x169e   : > { %v3623_v11 = vsel %vm2630_vm6, %v3622_v10, -inf }
0x169f   : > { %3624 = vmax.xlane.f32.xlu1 %v3623_v11 }
0x16b0   : > { %5577 = vrot.lane.b32.xlu1 %v5576_v20, %s5978_s14 }
0x16b4   : > { %5582 = vrot.lane.b32.xlu1 %v5581_v22, %s5978_s14 }
0x172c   : > { %v3625_v12 = vpop.xlane.xlu1 %3624 }
0x172d   : > { %v3626_v13 = vsub.f32 %v3622_v10, %v3625_v12  ;;  %v5427_v10 = vpack.c.bf16 %v4065_v7, %v4064_v2  ;;  %v5673_v2 = vld [vmem:[%s6388_s17 + $0x18] sm:$0xff] }
0x172f   : > { %v3627_v14 = vmul.f32 1.442695, %v3626_v13 }
0x1730   : > { %v5578_v25 = vpop.permute.xlu1 %5577 }
0x1731   : > { %5650 = vpow2.f32 %v3627_v14  ;;  %v5580_v28 = vunpack.i.h.bf16 %v5578_v25  ;;  %v5579_v29 = vunpack.i.l.bf16 %v5578_v25 }
0x1733   : > { %v5408_v53 = vpack.c.bf16 %v5580_v28, %v5579_v29 }
0x1734   : > { %v5583_v30 = vpop.permute.xlu1 %5582 }
0x1735   : > { %v5585_v59 = vunpack.i.h.bf16 %v5583_v30  ;;  %v5584_v32 = vunpack.i.l.bf16 %v5583_v30 }
0x1737   : > { %v5412_v35 = vpack.c.bf16 %v5585_v59, %v5584_v32 }
0x173b   : > { %v5651_v15 = vpop.eup %5650 }
0x173c   : > { %v3629_v16 = vsel %vm2630_vm6, %v5651_v15, 0.0 }
0x173d   : > { %3630 = vadd.xlane.f32.xlu0 %v3629_v16 }
0x1753   : > { %3634 = vrot.lane.b32.xlu0 %v3541_v0, %s5978_s14  ;;  %v4062_v0 = vld [vmem:[#allocation13 + $0xe0] sm:$0xff] }
0x1754   : > { %v5591_v4 = vpack.i.bf16 %v4063_v1, %v4062_v0  ;;  %v5424_v6 = vpack.c.bf16 %v4063_v1, %v4062_v0 }
0x17ca   : > { %v3631_v24 = vpop.xlane.xlu0 %3630 }
0x17cb   : > { %5652 = vrcp.f32 %v3631_v24 }
0x17ce   : > { %v3635_v26 = vpop.permute.xlu0 %3634 }
0x17cf   : > { %5262 = vmatpush3.msra.mxu1 %v3635_v26 }
0x17d0   : > { %5409 = vmatprep.subr.bf16.mxu1 %v5408_v53 }
0x17d5   : > { %v5653_v33 = vpop.eup %5652 }
0x17d6   : > { %v3633_v34 = vmul.f32 %v5653_v33, %v5651_v15 }
0x17d8   : > { %5264 = vmatmul.mubr.msk.f32.vlgmr.msra.gmra.mrb[34].mxu1 %vm1202_vm2, %v3633_v34 }
0x17d9   : > { %5411 = vmatpush3.bf16.msra.mxu1 %v5408_v53  ;;  %5285 = vmatprep.mubr.msk.f32.mxu1 %vm788_vm0, %v3710_v36 }
0x17da   : > { %5413 = vmatprep.subr.bf16.mxu1 %v5412_v35 }
0x17dd   : > { %5415 = vmatpush3.bf16.msra.mxu1 %v5412_v35 }
0x17de   : > { %5420 = vmatprep.subr.bf16.mxu1 %v5980_v46 }
0x17e0   : > { %5286 = vmatmul.mubr.msk.f32.vlgmr.msra.gmra.mrb[36].mxu1 %vm788_vm0, %v6773_v37 }
0x17e1   : > { %5299 = vmatprep.mubr.msk.f32.mxu1 %vm5977_vm1, %v5976_v31 }
0x18ab   : > { %v3706_v38 = vpop.f32.mrb[34].mxu1 }
0x18ac   : > { %v5265_v39 = vpop.f32.mrb[35].mxu1  ;;  %5275 = vmatmul.mubr.msk.f32.vlgmr.msra.gmra.mrb[36].mxu0 %vm788_vm0, %v3706_v38 }
0x18ad   : > { %5292 = vmatprep.mubr.msk.f32.mxu0 %vm5977_vm1, %v5976_v31 }
0x18b3   : > { %v5287_v40 = vpop.f32.mrb[36].mxu1 }
0x18b4   : > { %v3879_v42 = vpop.f32.mrb[37].mxu1 }
0x18b5   : > { %v5586_v44 = vpack.i.bf16 %v5287_v40, %v3879_v42  ;;  %v5417_v45 = vpack.c.bf16 %v5287_v40, %v3879_v42 }
0x18b7   : > { %5419 = vmatpush3.bf16.xpose.msk.msra.mxu0 %vm6785_vm7, %v5417_v45 }
0x197f   : > { %v3787_v47 = vpop.f32.mrb[36].mxu0 }
0x1980   : > { %v5276_v48 = vpop.f32.mrb[37].mxu0  ;;  %5293 = vmatmul.mubr.msk.f32.vlgmr.msra.gmra.mrb[38].mxu0 %vm788_vm0, %v3787_v47 }
0x1981   : > { %5321 = vmatprep.mubr.msk.f32.mxu0 %vm788_vm0, %v3710_v36 }
0x1a53   : > { %v3963_v49 = vpop.f32.mrb[38].mxu0 }
0x1a54   : > { %v3967_v51 = vmul.f32 0.17677669, %v3963_v49  ;;  %v5294_v52 = vpop.f32.mrb[39].mxu0 }
0x1a56   : > { %v3968_v54 = vadd.f32 %v3967_v51, %v6797_v50 }
0x1a58   : > { %v3970_v27 = vsel %vm3969_vm8, %v3968_v54, -inf }
0x1a59   : > { %3971 = vmax.xlane.f32.xlu0 %v3970_v27  ;;  %v5670_v27 = vld [vmem:[%s6388_s17] sm:$0xff] }
0x1a6f   : > { %5587 = vrot.lane.b32.xlu0 %v5586_v44, %s5978_s14 }
0x1a73   : > { %5597 = vrot.lane.b32.xlu0 %v5596_v8, %s5978_s14 }
0x1ae6   : > { %v3972_v55 = vpop.xlane.xlu0 %3971 }
0x1ae7   : > { %v3973_v56 = vsub.f32 %v3968_v54, %v3972_v55 }
0x1ae9   : > { %v3974_v57 = vmul.f32 1.442695, %v3973_v56 }
0x1aea   : > { %v5588_v58 = vpop.permute.xlu0 %5587 }
0x1aeb   : > { %5654 = vpow2.f32 %v3974_v57  ;;  %v5590_v60 = vunpack.i.h.bf16 %v5588_v58  ;;  %v5589_v61 = vunpack.i.l.bf16 %v5588_v58  ;;  %v5671_v58 = vld [vmem:[%s6388_s17 + $0x8] sm:$0xff] }
0x1aed   : > { %v5421_v62 = vpack.c.bf16 %v5590_v60, %v5589_v61 }
0x1aee   : > { %v5598_v13 = vpop.permute.xlu0 %5597 }
0x1aef   : > { %5422 = vmatpush3.bf16.msra.mxu1 %v5421_v62  ;;  %v5600_v16 = vunpack.i.h.bf16 %v5598_v13  ;;  %v5599_v17 = vunpack.i.l.bf16 %v5598_v13 }
0x1af0   : > { %5423 = vmatprep.subr.bf16.mxu1 %v5980_v46 }
0x1af1   : > { %v5433_v19 = vpack.c.bf16 %v5600_v16, %v5599_v17 }
0x1af5   : > { %v5655_v3 = vpop.eup %5654 }
0x1af6   : > { %v3976_v63 = vsel %vm3969_vm8, %v5655_v3, 0.0 }
0x1af7   : > { %3977 = vadd.xlane.f32.xlu1 %v3976_v63  ;;  %v5672_v63 = vld [vmem:[%s6388_s17 + $0x10] sm:$0xff] }
0x1b08   : > { %5592 = vrot.lane.b32.xlu1 %v5591_v4, %s5978_s14 }
0x1b84   : > { %v3978_v11 = vpop.xlane.xlu1 %3977 }
0x1b85   : > { %5656 = vrcp.f32 %v3978_v11 }
0x1b88   : > { %v5593_v12 = vpop.permute.xlu1 %5592 }
0x1b89   : > { %v5595_v14 = vunpack.i.h.bf16 %v5593_v12  ;;  %v5594_v15 = vunpack.i.l.bf16 %v5593_v12 }
0x1b8b   : > { %v5429_v18 = vpack.c.bf16 %v5595_v14, %v5594_v15 }
0x1b8d   : > { %5430 = vmatprep.subr.bf16.mxu0 %v5429_v18 }
0x1b8e   : > { %5432 = vmatpush3.bf16.msra.mxu0 %v5429_v18 }
0x1b8f   : > { %v5657_v20 = vpop.eup %5656  ;;  %5434 = vmatprep.subr.bf16.mxu0 %v5433_v19 }
0x1b90   : > { %v3980_v41 = vmul.f32 %v5657_v20, %v5655_v3 }
0x1b92   : > { %5300 = vmatmul.mubr.msk.f32.vlgmr.msra.gmra.mrb[38].mxu1 %vm3987_vm9, %v3980_v41  ;;  %5436 = vmatpush3.bf16.msra.mxu0 %v5433_v19 }
0x1b93   : > { %5425 = vmatpush3.bf16.msra.mxu1 %v5424_v6  ;;  %5310 = vmatprep.mubr.msk.f32.mxu1 %vm5977_vm1, %v5976_v31 }
0x1b94   : > { %5426 = vmatprep.subr.bf16.mxu1 %v5980_v46  ;;  %5441 = vmatprep.subr.bf16.mxu0 %v5980_v46 }
0x1b95   : > { %5322 = vmatmul.mubr.msk.f32.vlgmr.msra.gmra.mrb[40].mxu0 %vm788_vm0, %v6773_v37 }
0x1b96   : > { %5335 = vmatprep.mubr.msk.f32.mxu0 %vm5977_vm1, %v5976_v31 }
0x1b97   : > { %5428 = vmatpush3.bf16.msra.mxu1 %v5427_v10 }
0x1b98   : > { %5437 = vmatprep.subr.bf16.mxu1 %v5980_v46 }
0x1c65   : > { %v4057_v21 = vpop.f32.mrb[38].mxu1 }
0x1c66   : > { %v5301_v22 = vpop.f32.mrb[39].mxu1  ;;  %5311 = vmatmul.mubr.msk.f32.vlgmr.msra.gmra.mrb[40].mxu1 %vm788_vm0, %v4057_v21 }
0x1c67   : > { %5328 = vmatprep.mubr.msk.f32.mxu1 %vm5977_vm1, %v5976_v31 }
0x1c68   : > { %v5323_v23 = vpop.f32.mrb[40].mxu0 }
0x1c69   : > { %v4221_v24 = vpop.f32.mrb[41].mxu0 }
0x1c6a   : > { %v5601_v25 = vpack.i.bf16 %v5323_v23, %v4221_v24  ;;  %v5438_v26 = vpack.c.bf16 %v5323_v23, %v4221_v24 }
0x1c6c   : > { %5440 = vmatpush3.bf16.xpose.msk.msra.mxu1 %vm6785_vm7, %v5438_v26 }
0x1d39   : > { %v4135_v28 = vpop.f32.mrb[40].mxu1 }
0x1d3a   : > { %v5312_v29 = vpop.f32.mrb[41].mxu1  ;;  %5329 = vmatmul.mubr.msk.f32.vlgmr.msra.gmra.mrb[42].mxu1 %vm788_vm0, %v4135_v28 }
0x1e0d   : > { %v4305_v53 = vpop.f32.mrb[42].mxu1 }
0x1e0e   : > { %v4309_v46 = vmul.f32 0.17677669, %v4305_v53  ;;  %v5330_v30 = vpop.f32.mrb[43].mxu1 }
0x1e10   : > { %v4310_v59 = vadd.f32 %v4309_v46, %v6797_v50 }
0x1e12   : > { %v4311_v32 = vsel %vm3969_vm8, %v4310_v59, -inf }
0x1e13   : > { %4312 = vmax.xlane.f32.xlu1 %v4311_v32 }
0x1ea0   : > { %v4313_v31 = vpop.xlane.xlu1 %4312 }
0x1ea1   : > { %v4314_v33 = vsub.f32 %v4310_v59, %v4313_v31 }
0x1ea3   : > { %v4315_v34 = vmul.f32 1.442695, %v4314_v33 }
0x1ea5   : > { %5658 = vpow2.f32 %v4315_v34 }
0x1eaf   : > { %v5659_v35 = vpop.eup %5658 }
0x1eb0   : > { %v4317_v36 = vsel %vm3969_vm8, %v5659_v35, 0.0 }
0x1eb1   : > { %4318 = vadd.xlane.f32.xlu0 %v4317_v36  ;;  %v4881_v36 = vld [vmem:[%s6991_s13] ss:$0 sm:$0xff] }
0x1ec7   : > { %5602 = vrot.lane.b32.xlu0 %v5601_v25, %s5978_s14 }
0x1f3e   : > { %v4319_v37 = vpop.xlane.xlu0 %4318 }
0x1f3f   : > { %5660 = vrcp.f32 %v4319_v37 }
0x1f42   : > { %v5603_v38 = vpop.permute.xlu0 %5602 }
0x1f43   : > { %v5605_v39 = vunpack.i.h.bf16 %v5603_v38  ;;  %v5604_v40 = vunpack.i.l.bf16 %v5603_v38 }
0x1f45   : > { %v5442_v42 = vpack.c.bf16 %v5605_v39, %v5604_v40  ;;  %v4882_v39 = vld [vmem:[%s6992_s25] ss:$0 sm:$0xff] }
0x1f47   : > { %5443 = vmatpush3.bf16.msra.mxu0 %v5442_v42 }
0x1f49   : > { %v5661_v43 = vpop.eup %5660 }
0x1f4a   : > { %v4321_v44 = vmul.f32 %v5661_v43, %v5659_v35 }
0x1f4c   : > { %5336 = vmatmul.mubr.msk.f32.vlgmr.msra.gmra.mrb[42].mxu0 %vm3987_vm9, %v4321_v44 }
0x201f   : > { %v4397_v45 = vpop.f32.mrb[42].mxu0 }
0x2020   : > { %v4408_v47 = vrot.slane %v4397_v45, %v6426_v5  ;;  %v5337_v48 = vpop.f32.mrb[43].mxu0 }
0x2022   : > { %v4409_v49 = vcombine.high %v4408_v47, %v4408_v47  ;;  %v4416_v50 = vrot.slane %v4408_v47, %v6426_v5 }
0x2024   : > { %v4423_v51 = vrot.slane %v4409_v49, %v6426_v5  ;;  %v4424_v52 = vcombine.high %v4416_v50, %v4416_v50  ;;  %v4429_v54 = vrot.slane %v4416_v50, %v6429_v9 }
0x2026   : > { %v4446_v55 = vadd.f32 %v5670_v27, %v4429_v54  ;;  %v4433_v56 = vrot.slane %v4423_v51, %v6429_v9  ;;  %v4437_v61 = vrot.slane %v4424_v52, %v6429_v9  ;;  %v4425_v62 = vcombine.high %v4423_v51, %v4423_v51 }
0x2028   : > { %v4450_v57 = vsel %vm788_vm0, %v4446_v55, 0.0  ;;  %v4447_v60 = vadd.f32 %v5671_v58, %v4433_v56  ;;  %v4448_v5 = vadd.f32 %v5672_v63, %v4437_v61  ;;  %v4441_v0 = vrot.slane %v4425_v62, %v6429_v9 }
0x2029   : > { %4451 = vadd.xlane.f32.xlu1 %v4450_v57 }
0x202a   : > { %v4453_v3 = vsel %vm788_vm0, %v4447_v60, 0.0  ;;  %v4456_v1 = vsel %vm788_vm0, %v4448_v5, 0.0  ;;  %v4449_v4 = vadd.f32 %v5673_v2, %v4441_v0 }
0x202c   : > { %v4459_v6 = vsel %vm788_vm0, %v4449_v4, 0.0 }
0x202d   : > { %4454 = vadd.xlane.f32.xlu1 %v4453_v3 }
0x2031   : > { %4457 = vadd.xlane.f32.xlu1 %v4456_v1 }
0x2035   : > { %4460 = vadd.xlane.f32.xlu1 %v4459_v6 }
0x20b6   : > { %v4452_v7 = vpop.xlane.xlu1 %4451 }
0x20b7   : > { %v4463_v8 = vmul.f32 0.03125, %v4452_v7 }
0x20b9   : > { %v4467_v10 = vsub.f32 %v4446_v55, %v4463_v8 }
0x20ba   : > { %v4455_v11 = vpop.xlane.xlu1 %4454 }
0x20bb   : > { %v4464_v12 = vmul.f32 0.03125, %v4455_v11  ;;  %v4471_v13 = vmul.f32 %v4467_v10, %v4467_v10 }
0x20bd   : > { %v4468_v14 = vsub.f32 %v4447_v60, %v4464_v12  ;;  %v4475_v15 = vsel %vm788_vm0, %v4471_v13, 0.0 }
0x20be   : > { %v4458_v16 = vpop.xlane.xlu1 %4457  ;;  %4476 = vadd.xlane.f32.xlu1 %v4475_v15 }
0x20bf   : > { %v4465_v9 = vmul.f32 0.03125, %v4458_v16  ;;  %v4472_v17 = vmul.f32 %v4468_v14, %v4468_v14 }
0x20c1   : > { %v4469_v18 = vsub.f32 %v4448_v5, %v4465_v9  ;;  %v4478_v19 = vsel %vm788_vm0, %v4472_v17, 0.0 }
0x20c2   : > { %4479 = vadd.xlane.f32.xlu1 %v4478_v19  ;;  %v4461_v20 = vpop.xlane.xlu1 %4460 }
0x20c3   : > { %v4466_v41 = vmul.f32 0.03125, %v4461_v20  ;;  %v4473_v21 = vmul.f32 %v4469_v18, %v4469_v18 }
0x20c5   : > { %v4470_v22 = vsub.f32 %v4449_v4, %v4466_v41  ;;  %v4481_v23 = vsel %vm788_vm0, %v4473_v21, 0.0 }
0x20c6   : > { %4482 = vadd.xlane.f32.xlu0 %v4481_v23 }
0x20c7   : > { %v4474_v24 = vmul.f32 %v4470_v22, %v4470_v22 }
0x20c9   : > { %v4484_v25 = vsel %vm788_vm0, %v4474_v24, 0.0 }
0x20ca   : > { %4485 = vadd.xlane.f32.xlu1 %v4484_v25 }
0x214b   : > { %v4477_v26 = vpop.xlane.xlu1 %4476 }
0x214c   : > { %v4487_v28 = vmul.f32 0.03125, %v4477_v26 }
0x214e   : > { %v4491_v29 = vadd.f32 1e-05, %v4487_v28 }
0x214f   : > { %v4480_v53 = vpop.xlane.xlu1 %4479 }
0x2150   : > { %5662 = vrsqrt.f32 %v4491_v29  ;;  %v4488_v46 = vmul.f32 0.03125, %v4480_v53 }
0x2152   : > { %v4492_v30 = vadd.f32 1e-05, %v4488_v46 }
0x2153   : > { %v4483_v59 = vpop.xlane.xlu0 %4482 }
0x2154   : > { %5664 = vrsqrt.f32 %v4492_v30  ;;  %v4489_v32 = vmul.f32 0.03125, %v4483_v59 }
0x2156   : > { %v4493_v31 = vadd.f32 1e-05, %v4489_v32 }
0x2157   : > { %v4486_v33 = vpop.xlane.xlu1 %4485 }
0x2158   : > { %5666 = vrsqrt.f32 %v4493_v31  ;;  %v4490_v34 = vmul.f32 0.03125, %v4486_v33 }
0x215a   : > { %v5663_v35 = vpop.eup %5662  ;;  %v4494_v37 = vadd.f32 1e-05, %v4490_v34 }
0x215b   : > { %v4499_v38 = vmul.f32 %v5663_v35, %v4467_v10 }
0x215c   : > { %5668 = vrsqrt.f32 %v4494_v37 }
0x215d   : > { %v4510_v40 = vmul.f32 %v4881_v36, %v4499_v38 }
0x215e   : > { %v5665_v42 = vpop.eup %5664 }
0x215f   : > { %v4521_v43 = vadd.f32 %v4882_v39, %v4510_v40  ;;  %v4500_v44 = vmul.f32 %v5665_v42, %v4468_v14 }
0x2161   : > { %v4511_v45 = vmul.f32 %v4881_v36, %v4500_v44  ;;  %4525 = vst.msk [vmem:[%s709_s22] sm:$0xff] %vm788_vm0, %v4521_v43 }
0x2162   : > { %v5667_v47 = vpop.eup %5666 }
0x2163   : > { %v4522_v48 = vadd.f32 %v4882_v39, %v4511_v45  ;;  %v4501_v49 = vmul.f32 %v5667_v47, %v4469_v18 }
0x2165   : > { %v4512_v50 = vmul.f32 %v4881_v36, %v4501_v49  ;;  %4526 = vst.msk [vmem:[%s709_s22 + $0x8] sm:$0xff] %vm788_vm0, %v4522_v48 }
0x2166   : > { %v5669_v51 = vpop.eup %5668 }
0x2167   : > { %v4523_v52 = vadd.f32 %v4882_v39, %v4512_v50  ;;  %v4502_v54 = vmul.f32 %v5669_v51, %v4470_v22 }
0x2169   : > { %4527 = vst.msk [vmem:[%s709_s22 + $0x10] sm:$0xff] %vm788_vm0, %v4523_v52  ;;  %v4513_v27 = vmul.f32 %v4881_v36, %v4502_v54 }
0x216b   : > { %v4524_v55 = vadd.f32 %v4882_v39, %v4513_v27 }
0x216d   : > { %4528 = vst.msk [vmem:[%s709_s22 + $0x18] sm:$0xff] %vm788_vm0, %v4524_v55 }
0x216e   : > { %5895 = shalt.err (!%p5892_p8)
}
0x216f   : > { %s5896_s21 = scalar_lea.hbm %s6860_s16, 512  ;;  %s5900_s19 = scalar_lea.hbm %s6994_s9, 1024 }
0x2170   : > { %p5897_p10 = scmp.ne.s32.totalorder %s6860_s16, %s5896_s21  ;;  %p5901_p9 = scmp.lt.u32.totalorder %s6860_s16, %s6994_s9 }
0x2171   : > { %p5902_p6 = scmp.lt.u32.totalorder %s5900_s19, %s5896_s21  ;;  %p5904_p7 = scmp.lt.u32.totalorder %s5896_s21, %s6860_s16 }
0x2172   : > { %p5898_p0 = pnand %p5897_p10, %p6995_p4 }
0x2173   : > { %p5903_p11 = por %p5902_p6, %p5901_p9 }
0x2174   : > { %p5899_p1 = pneg %p5898_p0 }
0x2175   : > { %p5905_p3 = por %p5904_p7, %p5903_p11 }
0x2177   : > { %p5906_p5 = pnand %p5905_p3, %p5899_p1 }
0x2179   : > { %5909 = shalt.err (!%p5906_p5)
}
0x217a   : > { %s5982_s13 = smov 128   ;;  %s5983_s14 = smov 8  }
0x217b   : > { %5460 = dma.vmem_to_hbm [thread:$0]  (%p6995_p4), %s6862_s24, 512, %s6860_s16, %s4530_s30, %s5982_s13, %s5982_s13, %s5983_s14  }
0x217c PF: > { %s6996_s11 = sld [smem:[#allocation21_spill]]  ;;  %s6997_s25 = sld [smem:[#allocation23_spill]] }
0x217d   : > { %p6999_p12 = scmp.ge.s32.totalorder %s5964_s28, 2 }
0x2182   : > { %s4558_s22 = sand.u32 1, %s6996_s11   ;;  %p6998_p2 = scmp.ne.s32.totalorder %s6997_s25, 0 }
0x2183   : > { %s4559_s8 = scalar_lea.sflag [#allocation4], %s4558_s22 }
0x2184   : > { %p5486_p13 = pnand %p6999_p12, %p6998_p2 }
0x2186   : > { %5947 = dma.done.wait (!%p5486_p13), %s4559_s8, 512  }
0x2187   : > { %5949 = vsyncadd (!%p5486_p13), %s4559_s8, 4294966784  ;;  %s7000_s28 = sld [smem:[#allocation24_spill]]  ;;  %s7001_s18 = sld [smem:[#allocation22_spill]] }
0x2188   : > { %s7002_s27 = sld [smem:[#allocation25_spill]]  ;;  %s7003_s25 = smov %s5956_s26 }
0x218d   : > { %p35_p8 = scmp.ge.s32.totalorder %s7000_s28, 4   ;;  %s7004_s26 = smov %s7001_s18 }
0x218f   :  { %37 = sbr.rel (!%p35_p8) target bundleno = 21 (0x15), region = 201 }
0x2196   :  { %4564 = vsyncpa [#allocation3], 1 }
0x2197   :  { %4566 = vsyncpa [#allocation3 + $0x1], 1 }
0x2198   :  { %4567 = vsyncpa [#allocation6], 1 }
0x2199   :  { %4569 = vsyncpa [#allocation6 + $0x1], 1 }
0x219a   :  { %4570 = vsyncpa [#allocation9], 1 }
0x219b   :  { %4572 = vsyncpa [#allocation9 + $0x1], 1 }
0x219c   :  { %4573 = vsyncpa [#allocation12], 1 }
0x219d   :  { %4575 = vsyncpa [#allocation12 + $0x1], 1 }
0x219e   :  { %4576 = vsyncpa [#allocation4], 1 }
0x219f   :  { %4578 = vsyncpa [#allocation4 + $0x1], 1 }

</bundles_post_ra>
